<compile_context>
chip_gen: v7x
topology: tpu7x:2x2x1
jax: 0.10.0
libtpu: 0.0.40
codegen_flags: <defaults>
</compile_context>

<pallas_src>
import functools
import math

import jax
import jax.numpy as jnp
from jax import lax
from jax.experimental import pallas as pl
from jax.experimental.pallas import tpu as pltpu


_LN_EPS = 1e-5
_MASK_VALUE = -1000000.0          # matches sequence_mask(value=-1000000.0)


def _layer_norm(x_f32, gamma_ref, beta_ref):
    """LayerNorm over the last axis (PyTorch nn.LayerNorm, biased variance)."""
    mu = jnp.mean(x_f32, axis=-1, keepdims=True)
    xc = x_f32 - mu
    var = jnp.mean(xc * xc, axis=-1, keepdims=True)
    inv = lax.rsqrt(var + jnp.float32(_LN_EPS))
    return (xc * inv * gamma_ref[...].astype(jnp.float32)
            + beta_ref[...].astype(jnp.float32))


def _encoder_block_kernel(
        vl_ref,                       # SMEM (B,) int32      (scalar prefetch)
        x_ref,                        # VMEM (1, S, H)       full sequence (K/V + q tile)
        wq_ref, wk_ref, wv_ref,       # VMEM (NH, H, Dh)     per-head projections
        wo_ref,                       # VMEM (NH, Dh, H)     per-head rows of W_o
        g1_ref, be1_ref,              # VMEM (1, H)          LayerNorm 1
        w1_ref, b1_ref,               # VMEM (NC, H, FC), (NC, 1, FC)  FFN dense1 (F-chunked)
        w2_ref, b2_ref,               # VMEM (NC, FC, H), (1, H)       FFN dense2 (F-chunked)
        g2_ref, be2_ref,              # VMEM (1, H)          LayerNorm 2
        o_ref):                       # VMEM (1, Tq, H)
    b = pl.program_id(0)
    num_heads, _, dh = wq_ref.shape
    n_chunks = w1_ref.shape[0]
    _, seq, hid = x_ref.shape
    tq = o_ref.shape[1]

    cdt = wq_ref.dtype            # MXU operand dtype (bf16 weights -> bf16 matmuls)

    # Full sequence (K/V source); the query tile is a row slice of the SAME
    # block -- no duplicated q input stream / extra DMA.
    xkv = x_ref[0]                                                    # (S, H)
    if tq == seq:
        xq = xkv
    else:
        q_start = pl.multiple_of(pl.program_id(1) * tq, tq)
        xq = x_ref[0, pl.ds(q_start, tq), :]                          # (Tq, H)

    xq_c = xq.astype(cdt)
    xkv_c = xkv.astype(cdt)

    # Key-position mask (same for every query row, per torch sequence_mask).
    vl = vl_ref[b]
    mask = lax.broadcasted_iota(jnp.int32, (tq, seq), 1) < vl
    scale = jnp.float32(1.0 / math.sqrt(dh))

    # ---- multi-head attention: per-head projections, accumulate into W_o ----
    mha = jnp.zeros((tq, hid), jnp.float32)
    for h in range(num_heads):                      # static unroll over heads
        qh = (jnp.dot(xq_c, wq_ref[h], preferred_element_type=jnp.float32)
              * scale).astype(cdt)                                    # (Tq, Dh)
        kh = jnp.dot(xkv_c, wk_ref[h],
                     preferred_element_type=jnp.float32).astype(cdt)  # (S, Dh)
        vh = jnp.dot(xkv_c, wv_ref[h],
                     preferred_element_type=jnp.float32).astype(cdt)  # (S, Dh)

        # contract feature axes directly (no explicit K transpose)
        s = lax.dot_general(qh, kh, (((1,), (1,)), ((), ())),
                            preferred_element_type=jnp.float32)       # (Tq, S)
        s = jnp.where(mask, s, jnp.float32(_MASK_VALUE))

        m = jnp.max(s, axis=-1, keepdims=True)
        e = jnp.exp(s - m)
        inv = pl.reciprocal(jnp.sum(e, axis=-1, keepdims=True), approx=True)
        # normalize after the P.V matmul -> (Tq, Dh) multiply, not (Tq, S)
        head = jnp.dot(e.astype(cdt), vh,
                       preferred_element_type=jnp.float32) * inv      # (Tq, Dh)
        # TODO(synk): nn.Dropout on the attention weights is identity in eval mode.
        mha = mha + jnp.dot(head.astype(cdt), wo_ref[h],
                            preferred_element_type=jnp.float32)       # += head-h rows of W_o

    # ---- AddNorm 1 (dropout identity in eval mode) ----
    y = _layer_norm(mha + xq.astype(jnp.float32), g1_ref, be1_ref)    # (Tq, H) f32
    y_c = y.astype(cdt)

    # ---- position-wise FFN, tiled over the hidden (F) axis ----
    def ffn_chunk(c, acc):
        h1 = jnp.dot(y_c, w1_ref[c], preferred_element_type=jnp.float32)
        h1 = jnp.maximum(h1 + b1_ref[c].astype(jnp.float32), 0.0)
        return acc + jnp.dot(h1.astype(cdt), w2_ref[c],
                             preferred_element_type=jnp.float32)

    h2_init = jnp.zeros((tq, hid), jnp.float32)
    if n_chunks == 1:
        h2 = ffn_chunk(0, h2_init)
    else:
        h2 = lax.fori_loop(0, n_chunks, ffn_chunk, h2_init)
    h2 = h2 + b2_ref[...].astype(jnp.float32)

    # ---- AddNorm 2 ----
    o_ref[0] = _layer_norm(h2 + y, g2_ref, be2_ref).astype(o_ref.dtype)


def _pick_vmem_limit(bytes_needed):
    """Explicit VMEM budget: footprint + headroom, capped per chip generation."""
    try:
        cap = int(getattr(pltpu.get_tpu_info(), "vmem_capacity_bytes", 128 << 20))
    except Exception:                 # info query unavailable -> conservative cap
        cap = 64 << 20
    return int(min(max(int(bytes_needed), 32 << 20), cap - (8 << 20)))


@functools.partial(
    jax.jit,
    static_argnames=("num_heads", "block_q", "ffn_chunk", "param_dtype",
                     "dropout", "vmem_limit_bytes"))
def encoder_block(x, valid_lens, params, *, num_heads, block_q=None,
                  ffn_chunk=512, param_dtype=jnp.bfloat16, dropout=0.0,
                  vmem_limit_bytes=None):
    """Pallas-fused EncoderBlock.forward (eval mode).

    x: (B, S, H); valid_lens: None or (B,) ints.
    params: wq/wk/wv/wo (H, H), ln1_g/ln1_b (H,), w1 (H, F), b1 (F,),
            w2 (F, H), b2 (H,), ln2_g/ln2_b (H,).
    """
    B, S, H = x.shape
    F = params["w1"].shape[1]
    if block_q is None:
        block_q = S
        # ~256-row q tiles on long sequences: fills the 256-wide MXU (v6e/v7x)
        # while bounding the (Tq, S) score tile / VMEM footprint (v7x: 64 MiB).
        for cand in (256, 128):
            if S > cand and S % cand == 0:
                block_q = cand
                break
    assert S % block_q == 0, "seq length must be divisible by block_q"
    assert block_q == S or block_q % 8 == 0, "block_q must be a sublane multiple"
    assert H % num_heads == 0, "num_hiddens must be divisible by num_heads"
    dh = H // num_heads
    fc = min(ffn_chunk, F)
    assert F % fc == 0, "ffn hidden dim must be divisible by ffn_chunk"
    nc = F // fc
    # TODO(synk): dropout (attention weights & both AddNorms) is identity in
    # eval mode and is not applied here.

    if valid_lens is None:
        vl = jnp.full((B,), S, dtype=jnp.int32)
    else:
        vl = valid_lens.astype(jnp.int32)

    # Big matrices stored/passed in param_dtype (bf16 default: half HBM/VMEM
    # bytes + native bf16 MXU path); biases & LayerNorm affines stay f32.
    # Per-head / per-F-chunk blocks are built once here, in the wrapper.
    wq = params["wq"].astype(param_dtype).reshape(H, num_heads, dh).transpose(1, 0, 2)
    wk = params["wk"].astype(param_dtype).reshape(H, num_heads, dh).transpose(1, 0, 2)
    wv = params["wv"].astype(param_dtype).reshape(H, num_heads, dh).transpose(1, 0, 2)
    wo = params["wo"].astype(param_dtype).reshape(num_heads, dh, H)
    w1 = params["w1"].astype(param_dtype).reshape(H, nc, fc).transpose(1, 0, 2)
    b1 = params["b1"].astype(jnp.float32).reshape(nc, 1, fc)
    w2 = params["w2"].astype(param_dtype).reshape(nc, fc, H)
    b2 = params["b2"].astype(jnp.float32).reshape(1, H)
    g1 = params["ln1_g"].astype(jnp.float32).reshape(1, H)
    be1 = params["ln1_b"].astype(jnp.float32).reshape(1, H)
    g2 = params["ln2_g"].astype(jnp.float32).reshape(1, H)
    be2 = params["ln2_b"].astype(jnp.float32).reshape(1, H)

    def const_spec(shape):
        # Weight/bias blocks never change across the grid: single-buffer them
        # so they occupy VMEM once instead of twice.
        ndim = len(shape)
        return pl.BlockSpec(shape, lambda b, qi, vl_s, _n=ndim: (0,) * _n,
                            pipeline_mode=pl.Buffered(1))

    in_specs = [
        # Full-sequence X block (K/V source; q tile is a row slice of it).
        pl.BlockSpec((1, S, H), lambda b, qi, vl_s: (b, 0, 0)),
        const_spec((num_heads, H, dh)),     # W_q
        const_spec((num_heads, H, dh)),     # W_k
        const_spec((num_heads, H, dh)),     # W_v
        const_spec((num_heads, dh, H)),     # W_o
        const_spec((1, H)),                 # LN1 gamma
        const_spec((1, H)),                 # LN1 beta
        const_spec((nc, H, fc)),            # FFN W1 (F-chunked)
        const_spec((nc, 1, fc)),            # FFN b1
        const_spec((nc, fc, H)),            # FFN W2 (F-chunked)
        const_spec((1, H)),                 # FFN b2
        const_spec((1, H)),                 # LN2 gamma
        const_spec((1, H)),                 # LN2 beta
    ]
    out_spec = pl.BlockSpec((1, block_q, H), lambda b, qi, vl_s: (b, qi, 0))

    # ---- explicit VMEM budget & advisory cost estimate ----
    x_item = jnp.dtype(x.dtype).itemsize
    p_item = jnp.dtype(param_dtype).itemsize
    weight_bytes = (4 * H * H + 2 * H * F) * p_item + (2 * F + 10 * H) * 4
    block_bytes = 2 * 2 * (S * H + block_q * H) * x_item          # double-buffered X / out
    interm_bytes = 2 * 4 * (block_q * S + 3 * S * dh + block_q * fc + 6 * block_q * H)
    if vmem_limit_bytes is None:
        vmem_limit_bytes = _pick_vmem_limit(
            weight_bytes + block_bytes + interm_bytes + (4 << 20))

    steps = B * (S // block_q)
    flops = steps * 2 * (block_q * H * H            # Q projection
                         + 2 * S * H * H            # K, V projections
                         + 2 * block_q * S * H      # scores + P.V
                         + block_q * H * H          # W_o
                         + 2 * block_q * H * F)     # FFN
    cost = pl.CostEstimate(
        flops=int(flops),
        transcendentals=int(steps * num_heads * block_q * S),
        bytes_accessed=int(weight_bytes + 2 * B * S * H * x_item))

    out = pl.pallas_call(
        _encoder_block_kernel,
        out_shape=jax.ShapeDtypeStruct((B, S, H), x.dtype),
        grid_spec=pltpu.PrefetchScalarGridSpec(
            num_scalar_prefetch=1,
            grid=(B, S // block_q),
            in_specs=in_specs,
            out_specs=out_spec,
        ),
        compiler_params=pltpu.CompilerParams(
            # Megacore shards the batch axis only; q-tiles of one batch row
            # stay on one core so the full-sequence X block is fetched once.
            dimension_semantics=("parallel", "arbitrary"),
            vmem_limit_bytes=int(vmem_limit_bytes),
        ),
        cost_estimate=cost,
    )(vl, x, wq, wk, wv, wo, g1, be1, w1, b1, w2, b2, g2, be2)
    return out


# ----------------------------- pure-JAX reference ---------------------------

def _reference(x, valid_lens, params, num_heads, eps=1e-5):
    B, S, H = x.shape

    def split_heads(t):
        t = t.reshape(B, S, num_heads, -1).transpose(0, 2, 1, 3)
        return t.reshape(B * num_heads, S, -1)

    q = split_heads(x @ params["wq"])
    k = split_heads(x @ params["wk"])
    v = split_heads(x @ params["wv"])
    d = q.shape[-1]

    scores = jnp.einsum("bqd,bkd->bqk", q, k) / math.sqrt(d)
    if valid_lens is not None:
        vl = jnp.repeat(valid_lens, num_heads)
        mask = jnp.arange(S)[None, None, :] < vl[:, None, None]
        scores = jnp.where(mask, scores, -1000000.0)
    w = jax.nn.softmax(scores, axis=-1)
    o = jnp.einsum("bqk,bkv->bqv", w, v)
    o = o.reshape(B, num_heads, S, -1).transpose(0, 2, 1, 3).reshape(B, S, H)
    mha = o @ params["wo"]

    def ln(t, g, b):
        mu = t.mean(-1, keepdims=True)
        var = ((t - mu) ** 2).mean(-1, keepdims=True)
        return (t - mu) / jnp.sqrt(var + eps) * g + b

    y = ln(x + mha, params["ln1_g"], params["ln1_b"])
    h = jax.nn.relu(y @ params["w1"] + params["b1"])
    z = h @ params["w2"] + params["b2"]
    return ln(y + z, params["ln2_g"], params["ln2_b"])


if __name__ == "__main__":
    H, F, NH = 128, 256, 4          # hidden, ffn_hidden, heads

    key = jax.random.PRNGKey(0)
    ks = jax.random.split(key, 12)
    sc = 0.05
    params = dict(
        wq=jax.random.normal(ks[0], (H, H), jnp.float32) * sc,
        wk=jax.random.normal(ks[1], (H, H), jnp.float32) * sc,
        wv=jax.random.normal(ks[2], (H, H), jnp.float32) * sc,
        wo=jax.random.normal(ks[3], (H, H), jnp.float32) * sc,
        ln1_g=1.0 + 0.1 * jax.random.normal(ks[4], (H,), jnp.float32),
        ln1_b=0.1 * jax.random.normal(ks[5], (H,), jnp.float32),
        w1=jax.random.normal(ks[6], (H, F), jnp.float32) * sc,
        b1=0.1 * jax.random.normal(ks[7], (F,), jnp.float32),
        w2=jax.random.normal(ks[8], (F, H), jnp.float32) * sc,
        b2=0.1 * jax.random.normal(ks[9], (H,), jnp.float32),
        ln2_g=1.0 + 0.1 * jax.random.normal(ks[10], (H,), jnp.float32),
        ln2_b=0.1 * jax.random.normal(ks[11], (H,), jnp.float32),
    )

    def bf16_rounded(p):
        out = dict(p)
        for name in ("wq", "wk", "wv", "wo", "w1", "w2"):
            out[name] = p[name].astype(jnp.bfloat16).astype(jnp.float32)
        return out

    # --- run 1: masked attention, bf16 weights (default), block_q == S ---
    B, S = 2, 8
    x = jax.random.normal(jax.random.PRNGKey(42), (B, S, H), jnp.float32)
    valid_lens = jnp.array([3, 6], dtype=jnp.int32)
    out = encoder_block(x, valid_lens, params, num_heads=NH, dropout=0.5)
    out = jax.block_until_ready(out)
    ref = _reference(x, valid_lens, bf16_rounded(params), NH)
    err = float(jnp.max(jnp.abs(out - ref)))
    assert jnp.allclose(out, ref, atol=2e-2, rtol=2e-2), err

    # --- run 2: no mask, f32 weights, q-tiled (block_q < S), F-chunked FFN ---
    B2, S2 = 2, 16
    x2 = jax.random.normal(jax.random.PRNGKey(7), (B2, S2, H), jnp.float32)
    out2 = encoder_block(x2, None, params, num_heads=NH, block_q=8,
                         ffn_chunk=128, param_dtype=jnp.float32)
    out2 = jax.block_until_ready(out2)
    ref2 = _reference(x2, None, params, NH)
    err2 = float(jnp.max(jnp.abs(out2 - ref2)))
    assert jnp.allclose(out2, ref2, atol=1e-2, rtol=1e-2), err2

    print("KERNEL_OK")
</pallas_src>

<mosaic_0001>
module attributes {stable_mosaic.version = 11 : i64} {
  func.func @_encoder_block_kernel(%arg0: i32, %arg1: i32, %arg2: memref<2xi32, #tpu.memory_space<smem>>, %arg3: memref<1x8x128xf32, #tpu.memory_space<vmem>>, %arg4: memref<4x128x32xbf16, #tpu.memory_space<vmem>>, %arg5: memref<4x128x32xbf16, #tpu.memory_space<vmem>>, %arg6: memref<4x128x32xbf16, #tpu.memory_space<vmem>>, %arg7: memref<4x32x128xbf16, #tpu.memory_space<vmem>>, %arg8: memref<1x128xf32, #tpu.memory_space<vmem>>, %arg9: memref<1x128xf32, #tpu.memory_space<vmem>>, %arg10: memref<1x128x256xbf16, #tpu.memory_space<vmem>>, %arg11: memref<1x1x256xf32, #tpu.memory_space<vmem>>, %arg12: memref<1x256x128xbf16, #tpu.memory_space<vmem>>, %arg13: memref<1x128xf32, #tpu.memory_space<vmem>>, %arg14: memref<1x128xf32, #tpu.memory_space<vmem>>, %arg15: memref<1x128xf32, #tpu.memory_space<vmem>>, %arg16: memref<1x8x128xf32, #tpu.memory_space<vmem>>) attributes {dimension_semantics = [#tpu.dimension_semantics<parallel>, #tpu.dimension_semantics<arbitrary>], iteration_bounds = array<i64: 2, 1>, scalar_prefetch = 1 : i64, scratch_operands = 0 : i64, tpu.core_type = #tpu.core_type<tc>, window_params = [{transform_indices = @transform_0, window_bounds = array<i64: 1, 8, 128>}, {pipeline_mode = #tpu.pipeline_mode<synchronous>, transform_indices = @transform_1, window_bounds = array<i64: 4, 128, 32>}, {pipeline_mode = #tpu.pipeline_mode<synchronous>, transform_indices = @transform_2, window_bounds = array<i64: 4, 128, 32>}, {pipeline_mode = #tpu.pipeline_mode<synchronous>, transform_indices = @transform_3, window_bounds = array<i64: 4, 128, 32>}, {pipeline_mode = #tpu.pipeline_mode<synchronous>, transform_indices = @transform_4, window_bounds = array<i64: 4, 32, 128>}, {pipeline_mode = #tpu.pipeline_mode<synchronous>, transform_indices = @transform_5, window_bounds = array<i64: 1, 128>}, {pipeline_mode = #tpu.pipeline_mode<synchronous>, transform_indices = @transform_6, window_bounds = array<i64: 1, 128>}, {pipeline_mode = #tpu.pipeline_mode<synchronous>, transform_indices = @transform_7, window_bounds = array<i64: 1, 128, 256>}, {pipeline_mode = #tpu.pipeline_mode<synchronous>, transform_indices = @transform_8, window_bounds = array<i64: 1, 1, 256>}, {pipeline_mode = #tpu.pipeline_mode<synchronous>, transform_indices = @transform_9, window_bounds = array<i64: 1, 256, 128>}, {pipeline_mode = #tpu.pipeline_mode<synchronous>, transform_indices = @transform_10, window_bounds = array<i64: 1, 128>}, {pipeline_mode = #tpu.pipeline_mode<synchronous>, transform_indices = @transform_11, window_bounds = array<i64: 1, 128>}, {pipeline_mode = #tpu.pipeline_mode<synchronous>, transform_indices = @transform_12, window_bounds = array<i64: 1, 128>}, {transform_indices = @transform_13, window_bounds = array<i64: 1, 8, 128>}]} {
    %c0 = arith.constant 0 : index
    %c0_0 = arith.constant 0 : index
    %c0_1 = arith.constant 0 : index
    %0 = vector.load %arg3[%c0, %c0_0, %c0_1] : memref<1x8x128xf32, #tpu.memory_space<vmem>>, vector<1x8x128xf32>
    %1 = vector.shape_cast %0 : vector<1x8x128xf32> to vector<8x128xf32>
    %2 = arith.truncf %1 : vector<8x128xf32> to vector<8x128xbf16>
    %3 = arith.truncf %1 : vector<8x128xf32> to vector<8x128xbf16>
    %4 = arith.index_cast %arg0 : i32 to index
    %5 = memref.load %arg2[%4] : memref<2xi32, #tpu.memory_space<smem>>
    %6 = tpu.iota {dimensions = array<i32: 1>} : vector<8x8xi32>
    %7 = vector.broadcast %5 : i32 to vector<8x8xi32>
    %8 = arith.cmpi slt, %6, %7 : vector<8x8xi32>
    %cst = arith.constant 0.000000e+00 : f32
    %9 = vector.broadcast %cst : f32 to vector<8x128xf32>
    %c0_2 = arith.constant 0 : index
    %c0_3 = arith.constant 0 : index
    %c0_4 = arith.constant 0 : index
    %10 = vector.load %arg4[%c0_2, %c0_3, %c0_4] : memref<4x128x32xbf16, #tpu.memory_space<vmem>>, vector<1x128x32xbf16>
    %11 = vector.shape_cast %10 : vector<1x128x32xbf16> to vector<128x32xbf16>
    %cst_5 = arith.constant dense<0.000000e+00> : vector<8x32xf32>
    %12 = tpu.matmul %2, %11, %cst_5 {dimension_numbers = #tpu.dot_dimension_numbers<[1], [0], [0], [1], [0, 0, 1, 1], [], []>} : vector<8x128xbf16>, vector<128x32xbf16>, vector<8x32xf32> -> vector<8x32xf32>
    %cst_6 = arith.constant 0.176776692 : f32
    %13 = vector.broadcast %cst_6 : f32 to vector<8x32xf32>
    %14 = arith.mulf %12, %13 : vector<8x32xf32>
    %15 = arith.truncf %14 : vector<8x32xf32> to vector<8x32xbf16>
    %c0_7 = arith.constant 0 : index
    %c0_8 = arith.constant 0 : index
    %c0_9 = arith.constant 0 : index
    %16 = vector.load %arg5[%c0_7, %c0_8, %c0_9] : memref<4x128x32xbf16, #tpu.memory_space<vmem>>, vector<1x128x32xbf16>
    %17 = vector.shape_cast %16 : vector<1x128x32xbf16> to vector<128x32xbf16>
    %cst_10 = arith.constant dense<0.000000e+00> : vector<8x32xf32>
    %18 = tpu.matmul %3, %17, %cst_10 {dimension_numbers = #tpu.dot_dimension_numbers<[1], [0], [0], [1], [0, 0, 1, 1], [], []>} : vector<8x128xbf16>, vector<128x32xbf16>, vector<8x32xf32> -> vector<8x32xf32>
    %19 = arith.truncf %18 : vector<8x32xf32> to vector<8x32xbf16>
    %c0_11 = arith.constant 0 : index
    %c0_12 = arith.constant 0 : index
    %c0_13 = arith.constant 0 : index
    %20 = vector.load %arg6[%c0_11, %c0_12, %c0_13] : memref<4x128x32xbf16, #tpu.memory_space<vmem>>, vector<1x128x32xbf16>
    %21 = vector.shape_cast %20 : vector<1x128x32xbf16> to vector<128x32xbf16>
    %cst_14 = arith.constant dense<0.000000e+00> : vector<8x32xf32>
    %22 = tpu.matmul %3, %21, %cst_14 {dimension_numbers = #tpu.dot_dimension_numbers<[1], [0], [0], [1], [0, 0, 1, 1], [], []>} : vector<8x128xbf16>, vector<128x32xbf16>, vector<8x32xf32> -> vector<8x32xf32>
    %23 = arith.truncf %22 : vector<8x32xf32> to vector<8x32xbf16>
    %cst_15 = arith.constant dense<0.000000e+00> : vector<8x8xf32>
    %24 = tpu.matmul %15, %19, %cst_15 {dimension_numbers = #tpu.dot_dimension_numbers<[1], [1], [0], [0], [0, 0, 1, 0], [], []>} : vector<8x32xbf16>, vector<8x32xbf16>, vector<8x8xf32> -> vector<8x8xf32>
    %cst_16 = arith.constant -1.000000e+06 : f32
    %25 = vector.broadcast %cst_16 : f32 to vector<8x8xf32>
    %26 = arith.select %8, %24, %25 : vector<8x8xi1>, vector<8x8xf32>
    %cst_17 = arith.constant dense<0xFF800000> : vector<8xf32>
    %27 = vector.multi_reduction <maximumf>, %26, %cst_17 [1] : vector<8x8xf32> to vector<8xf32>
    %28 = vector.shape_cast %27 : vector<8xf32> to vector<8x1xf32>
    %29 = vector.broadcast %28 : vector<8x1xf32> to vector<8x8xf32>
    %30 = arith.subf %26, %29 : vector<8x8xf32>
    %31 = math.exp %30 : vector<8x8xf32>
    %cst_18 = arith.constant dense<0.000000e+00> : vector<8xf32>
    %32 = vector.multi_reduction <add>, %31, %cst_18 [1] : vector<8x8xf32> to vector<8xf32>
    %33 = vector.shape_cast %32 : vector<8xf32> to vector<8x1xf32>
    %34 = tpu.reciprocal %33 {approx = true} : vector<8x1xf32> -> vector<8x1xf32>
    %35 = arith.truncf %31 : vector<8x8xf32> to vector<8x8xbf16>
    %cst_19 = arith.constant dense<0.000000e+00> : vector<8x32xf32>
    %36 = tpu.matmul %35, %23, %cst_19 {dimension_numbers = #tpu.dot_dimension_numbers<[1], [0], [0], [1], [0, 0, 1, 1], [], []>} : vector<8x8xbf16>, vector<8x32xbf16>, vector<8x32xf32> -> vector<8x32xf32>
    %37 = vector.broadcast %34 : vector<8x1xf32> to vector<8x32xf32>
    %38 = arith.mulf %36, %37 : vector<8x32xf32>
    %39 = arith.truncf %38 : vector<8x32xf32> to vector<8x32xbf16>
    %c0_20 = arith.constant 0 : index
    %c0_21 = arith.constant 0 : index
    %c0_22 = arith.constant 0 : index
    %40 = vector.load %arg7[%c0_20, %c0_21, %c0_22] : memref<4x32x128xbf16, #tpu.memory_space<vmem>>, vector<1x32x128xbf16>
    %41 = vector.shape_cast %40 : vector<1x32x128xbf16> to vector<32x128xbf16>
    %cst_23 = arith.constant dense<0.000000e+00> : vector<8x128xf32>
    %42 = tpu.matmul %39, %41, %cst_23 {dimension_numbers = #tpu.dot_dimension_numbers<[1], [0], [0], [1], [0, 0, 1, 1], [], []>} : vector<8x32xbf16>, vector<32x128xbf16>, vector<8x128xf32> -> vector<8x128xf32>
    %43 = arith.addf %9, %42 : vector<8x128xf32>
    %c1 = arith.constant 1 : index
    %c0_24 = arith.constant 0 : index
    %c0_25 = arith.constant 0 : index
    %44 = vector.load %arg4[%c1, %c0_24, %c0_25] : memref<4x128x32xbf16, #tpu.memory_space<vmem>>, vector<1x128x32xbf16>
    %45 = vector.shape_cast %44 : vector<1x128x32xbf16> to vector<128x32xbf16>
    %cst_26 = arith.constant dense<0.000000e+00> : vector<8x32xf32>
    %46 = tpu.matmul %2, %45, %cst_26 {dimension_numbers = #tpu.dot_dimension_numbers<[1], [0], [0], [1], [0, 0, 1, 1], [], []>} : vector<8x128xbf16>, vector<128x32xbf16>, vector<8x32xf32> -> vector<8x32xf32>
    %cst_27 = arith.constant 0.176776692 : f32
    %47 = vector.broadcast %cst_27 : f32 to vector<8x32xf32>
    %48 = arith.mulf %46, %47 : vector<8x32xf32>
    %49 = arith.truncf %48 : vector<8x32xf32> to vector<8x32xbf16>
    %c1_28 = arith.constant 1 : index
    %c0_29 = arith.constant 0 : index
    %c0_30 = arith.constant 0 : index
    %50 = vector.load %arg5[%c1_28, %c0_29, %c0_30] : memref<4x128x32xbf16, #tpu.memory_space<vmem>>, vector<1x128x32xbf16>
    %51 = vector.shape_cast %50 : vector<1x128x32xbf16> to vector<128x32xbf16>
    %cst_31 = arith.constant dense<0.000000e+00> : vector<8x32xf32>
    %52 = tpu.matmul %3, %51, %cst_31 {dimension_numbers = #tpu.dot_dimension_numbers<[1], [0], [0], [1], [0, 0, 1, 1], [], []>} : vector<8x128xbf16>, vector<128x32xbf16>, vector<8x32xf32> -> vector<8x32xf32>
    %53 = arith.truncf %52 : vector<8x32xf32> to vector<8x32xbf16>
    %c1_32 = arith.constant 1 : index
    %c0_33 = arith.constant 0 : index
    %c0_34 = arith.constant 0 : index
    %54 = vector.load %arg6[%c1_32, %c0_33, %c0_34] : memref<4x128x32xbf16, #tpu.memory_space<vmem>>, vector<1x128x32xbf16>
    %55 = vector.shape_cast %54 : vector<1x128x32xbf16> to vector<128x32xbf16>
    %cst_35 = arith.constant dense<0.000000e+00> : vector<8x32xf32>
    %56 = tpu.matmul %3, %55, %cst_35 {dimension_numbers = #tpu.dot_dimension_numbers<[1], [0], [0], [1], [0, 0, 1, 1], [], []>} : vector<8x128xbf16>, vector<128x32xbf16>, vector<8x32xf32> -> vector<8x32xf32>
    %57 = arith.truncf %56 : vector<8x32xf32> to vector<8x32xbf16>
    %cst_36 = arith.constant dense<0.000000e+00> : vector<8x8xf32>
    %58 = tpu.matmul %49, %53, %cst_36 {dimension_numbers = #tpu.dot_dimension_numbers<[1], [1], [0], [0], [0, 0, 1, 0], [], []>} : vector<8x32xbf16>, vector<8x32xbf16>, vector<8x8xf32> -> vector<8x8xf32>
    %cst_37 = arith.constant -1.000000e+06 : f32
    %59 = vector.broadcast %cst_37 : f32 to vector<8x8xf32>
    %60 = arith.select %8, %58, %59 : vector<8x8xi1>, vector<8x8xf32>
    %cst_38 = arith.constant dense<0xFF800000> : vector<8xf32>
    %61 = vector.multi_reduction <maximumf>, %60, %cst_38 [1] : vector<8x8xf32> to vector<8xf32>
    %62 = vector.shape_cast %61 : vector<8xf32> to vector<8x1xf32>
    %63 = vector.broadcast %62 : vector<8x1xf32> to vector<8x8xf32>
    %64 = arith.subf %60, %63 : vector<8x8xf32>
    %65 = math.exp %64 : vector<8x8xf32>
    %cst_39 = arith.constant dense<0.000000e+00> : vector<8xf32>
    %66 = vector.multi_reduction <add>, %65, %cst_39 [1] : vector<8x8xf32> to vector<8xf32>
    %67 = vector.shape_cast %66 : vector<8xf32> to vector<8x1xf32>
    %68 = tpu.reciprocal %67 {approx = true} : vector<8x1xf32> -> vector<8x1xf32>
    %69 = arith.truncf %65 : vector<8x8xf32> to vector<8x8xbf16>
    %cst_40 = arith.constant dense<0.000000e+00> : vector<8x32xf32>
    %70 = tpu.matmul %69, %57, %cst_40 {dimension_numbers = #tpu.dot_dimension_numbers<[1], [0], [0], [1], [0, 0, 1, 1], [], []>} : vector<8x8xbf16>, vector<8x32xbf16>, vector<8x32xf32> -> vector<8x32xf32>
    %71 = vector.broadcast %68 : vector<8x1xf32> to vector<8x32xf32>
    %72 = arith.mulf %70, %71 : vector<8x32xf32>
    %73 = arith.truncf %72 : vector<8x32xf32> to vector<8x32xbf16>
    %c1_41 = arith.constant 1 : index
    %c0_42 = arith.constant 0 : index
    %c0_43 = arith.constant 0 : index
    %74 = vector.load %arg7[%c1_41, %c0_42, %c0_43] : memref<4x32x128xbf16, #tpu.memory_space<vmem>>, vector<1x32x128xbf16>
    %75 = vector.shape_cast %74 : vector<1x32x128xbf16> to vector<32x128xbf16>
    %cst_44 = arith.constant dense<0.000000e+00> : vector<8x128xf32>
    %76 = tpu.matmul %73, %75, %cst_44 {dimension_numbers = #tpu.dot_dimension_numbers<[1], [0], [0], [1], [0, 0, 1, 1], [], []>} : vector<8x32xbf16>, vector<32x128xbf16>, vector<8x128xf32> -> vector<8x128xf32>
    %77 = arith.addf %43, %76 : vector<8x128xf32>
    %c2 = arith.constant 2 : index
    %c0_45 = arith.constant 0 : index
    %c0_46 = arith.constant 0 : index
    %78 = vector.load %arg4[%c2, %c0_45, %c0_46] : memref<4x128x32xbf16, #tpu.memory_space<vmem>>, vector<1x128x32xbf16>
    %79 = vector.shape_cast %78 : vector<1x128x32xbf16> to vector<128x32xbf16>
    %cst_47 = arith.constant dense<0.000000e+00> : vector<8x32xf32>
    %80 = tpu.matmul %2, %79, %cst_47 {dimension_numbers = #tpu.dot_dimension_numbers<[1], [0], [0], [1], [0, 0, 1, 1], [], []>} : vector<8x128xbf16>, vector<128x32xbf16>, vector<8x32xf32> -> vector<8x32xf32>
    %cst_48 = arith.constant 0.176776692 : f32
    %81 = vector.broadcast %cst_48 : f32 to vector<8x32xf32>
    %82 = arith.mulf %80, %81 : vector<8x32xf32>
    %83 = arith.truncf %82 : vector<8x32xf32> to vector<8x32xbf16>
    %c2_49 = arith.constant 2 : index
    %c0_50 = arith.constant 0 : index
    %c0_51 = arith.constant 0 : index
    %84 = vector.load %arg5[%c2_49, %c0_50, %c0_51] : memref<4x128x32xbf16, #tpu.memory_space<vmem>>, vector<1x128x32xbf16>
    %85 = vector.shape_cast %84 : vector<1x128x32xbf16> to vector<128x32xbf16>
    %cst_52 = arith.constant dense<0.000000e+00> : vector<8x32xf32>
    %86 = tpu.matmul %3, %85, %cst_52 {dimension_numbers = #tpu.dot_dimension_numbers<[1], [0], [0], [1], [0, 0, 1, 1], [], []>} : vector<8x128xbf16>, vector<128x32xbf16>, vector<8x32xf32> -> vector<8x32xf32>
    %87 = arith.truncf %86 : vector<8x32xf32> to vector<8x32xbf16>
    %c2_53 = arith.constant 2 : index
    %c0_54 = arith.constant 0 : index
    %c0_55 = arith.constant 0 : index
    %88 = vector.load %arg6[%c2_53, %c0_54, %c0_55] : memref<4x128x32xbf16, #tpu.memory_space<vmem>>, vector<1x128x32xbf16>
    %89 = vector.shape_cast %88 : vector<1x128x32xbf16> to vector<128x32xbf16>
    %cst_56 = arith.constant dense<0.000000e+00> : vector<8x32xf32>
    %90 = tpu.matmul %3, %89, %cst_56 {dimension_numbers = #tpu.dot_dimension_numbers<[1], [0], [0], [1], [0, 0, 1, 1], [], []>} : vector<8x128xbf16>, vector<128x32xbf16>, vector<8x32xf32> -> vector<8x32xf32>
    %91 = arith.truncf %90 : vector<8x32xf32> to vector<8x32xbf16>
    %cst_57 = arith.constant dense<0.000000e+00> : vector<8x8xf32>
    %92 = tpu.matmul %83, %87, %cst_57 {dimension_numbers = #tpu.dot_dimension_numbers<[1], [1], [0], [0], [0, 0, 1, 0], [], []>} : vector<8x32xbf16>, vector<8x32xbf16>, vector<8x8xf32> -> vector<8x8xf32>
    %cst_58 = arith.constant -1.000000e+06 : f32
    %93 = vector.broadcast %cst_58 : f32 to vector<8x8xf32>
    %94 = arith.select %8, %92, %93 : vector<8x8xi1>, vector<8x8xf32>
    %cst_59 = arith.constant dense<0xFF800000> : vector<8xf32>
    %95 = vector.multi_reduction <maximumf>, %94, %cst_59 [1] : vector<8x8xf32> to vector<8xf32>
    %96 = vector.shape_cast %95 : vector<8xf32> to vector<8x1xf32>
    %97 = vector.broadcast %96 : vector<8x1xf32> to vector<8x8xf32>
    %98 = arith.subf %94, %97 : vector<8x8xf32>
    %99 = math.exp %98 : vector<8x8xf32>
    %cst_60 = arith.constant dense<0.000000e+00> : vector<8xf32>
    %100 = vector.multi_reduction <add>, %99, %cst_60 [1] : vector<8x8xf32> to vector<8xf32>
    %101 = vector.shape_cast %100 : vector<8xf32> to vector<8x1xf32>
    %102 = tpu.reciprocal %101 {approx = true} : vector<8x1xf32> -> vector<8x1xf32>
    %103 = arith.truncf %99 : vector<8x8xf32> to vector<8x8xbf16>
    %cst_61 = arith.constant dense<0.000000e+00> : vector<8x32xf32>
    %104 = tpu.matmul %103, %91, %cst_61 {dimension_numbers = #tpu.dot_dimension_numbers<[1], [0], [0], [1], [0, 0, 1, 1], [], []>} : vector<8x8xbf16>, vector<8x32xbf16>, vector<8x32xf32> -> vector<8x32xf32>
    %105 = vector.broadcast %102 : vector<8x1xf32> to vector<8x32xf32>
    %106 = arith.mulf %104, %105 : vector<8x32xf32>
    %107 = arith.truncf %106 : vector<8x32xf32> to vector<8x32xbf16>
    %c2_62 = arith.constant 2 : index
    %c0_63 = arith.constant 0 : index
    %c0_64 = arith.constant 0 : index
    %108 = vector.load %arg7[%c2_62, %c0_63, %c0_64] : memref<4x32x128xbf16, #tpu.memory_space<vmem>>, vector<1x32x128xbf16>
    %109 = vector.shape_cast %108 : vector<1x32x128xbf16> to vector<32x128xbf16>
    %cst_65 = arith.constant dense<0.000000e+00> : vector<8x128xf32>
    %110 = tpu.matmul %107, %109, %cst_65 {dimension_numbers = #tpu.dot_dimension_numbers<[1], [0], [0], [1], [0, 0, 1, 1], [], []>} : vector<8x32xbf16>, vector<32x128xbf16>, vector<8x128xf32> -> vector<8x128xf32>
    %111 = arith.addf %77, %110 : vector<8x128xf32>
    %c3 = arith.constant 3 : index
    %c0_66 = arith.constant 0 : index
    %c0_67 = arith.constant 0 : index
    %112 = vector.load %arg4[%c3, %c0_66, %c0_67] : memref<4x128x32xbf16, #tpu.memory_space<vmem>>, vector<1x128x32xbf16>
    %113 = vector.shape_cast %112 : vector<1x128x32xbf16> to vector<128x32xbf16>
    %cst_68 = arith.constant dense<0.000000e+00> : vector<8x32xf32>
    %114 = tpu.matmul %2, %113, %cst_68 {dimension_numbers = #tpu.dot_dimension_numbers<[1], [0], [0], [1], [0, 0, 1, 1], [], []>} : vector<8x128xbf16>, vector<128x32xbf16>, vector<8x32xf32> -> vector<8x32xf32>
    %cst_69 = arith.constant 0.176776692 : f32
    %115 = vector.broadcast %cst_69 : f32 to vector<8x32xf32>
    %116 = arith.mulf %114, %115 : vector<8x32xf32>
    %117 = arith.truncf %116 : vector<8x32xf32> to vector<8x32xbf16>
    %c3_70 = arith.constant 3 : index
    %c0_71 = arith.constant 0 : index
    %c0_72 = arith.constant 0 : index
    %118 = vector.load %arg5[%c3_70, %c0_71, %c0_72] : memref<4x128x32xbf16, #tpu.memory_space<vmem>>, vector<1x128x32xbf16>
    %119 = vector.shape_cast %118 : vector<1x128x32xbf16> to vector<128x32xbf16>
    %cst_73 = arith.constant dense<0.000000e+00> : vector<8x32xf32>
    %120 = tpu.matmul %3, %119, %cst_73 {dimension_numbers = #tpu.dot_dimension_numbers<[1], [0], [0], [1], [0, 0, 1, 1], [], []>} : vector<8x128xbf16>, vector<128x32xbf16>, vector<8x32xf32> -> vector<8x32xf32>
    %121 = arith.truncf %120 : vector<8x32xf32> to vector<8x32xbf16>
    %c3_74 = arith.constant 3 : index
    %c0_75 = arith.constant 0 : index
    %c0_76 = arith.constant 0 : index
    %122 = vector.load %arg6[%c3_74, %c0_75, %c0_76] : memref<4x128x32xbf16, #tpu.memory_space<vmem>>, vector<1x128x32xbf16>
    %123 = vector.shape_cast %122 : vector<1x128x32xbf16> to vector<128x32xbf16>
    %cst_77 = arith.constant dense<0.000000e+00> : vector<8x32xf32>
    %124 = tpu.matmul %3, %123, %cst_77 {dimension_numbers = #tpu.dot_dimension_numbers<[1], [0], [0], [1], [0, 0, 1, 1], [], []>} : vector<8x128xbf16>, vector<128x32xbf16>, vector<8x32xf32> -> vector<8x32xf32>
    %125 = arith.truncf %124 : vector<8x32xf32> to vector<8x32xbf16>
    %cst_78 = arith.constant dense<0.000000e+00> : vector<8x8xf32>
    %126 = tpu.matmul %117, %121, %cst_78 {dimension_numbers = #tpu.dot_dimension_numbers<[1], [1], [0], [0], [0, 0, 1, 0], [], []>} : vector<8x32xbf16>, vector<8x32xbf16>, vector<8x8xf32> -> vector<8x8xf32>
    %cst_79 = arith.constant -1.000000e+06 : f32
    %127 = vector.broadcast %cst_79 : f32 to vector<8x8xf32>
    %128 = arith.select %8, %126, %127 : vector<8x8xi1>, vector<8x8xf32>
    %cst_80 = arith.constant dense<0xFF800000> : vector<8xf32>
    %129 = vector.multi_reduction <maximumf>, %128, %cst_80 [1] : vector<8x8xf32> to vector<8xf32>
    %130 = vector.shape_cast %129 : vector<8xf32> to vector<8x1xf32>
    %131 = vector.broadcast %130 : vector<8x1xf32> to vector<8x8xf32>
    %132 = arith.subf %128, %131 : vector<8x8xf32>
    %133 = math.exp %132 : vector<8x8xf32>
    %cst_81 = arith.constant dense<0.000000e+00> : vector<8xf32>
    %134 = vector.multi_reduction <add>, %133, %cst_81 [1] : vector<8x8xf32> to vector<8xf32>
    %135 = vector.shape_cast %134 : vector<8xf32> to vector<8x1xf32>
    %136 = tpu.reciprocal %135 {approx = true} : vector<8x1xf32> -> vector<8x1xf32>
    %137 = arith.truncf %133 : vector<8x8xf32> to vector<8x8xbf16>
    %cst_82 = arith.constant dense<0.000000e+00> : vector<8x32xf32>
    %138 = tpu.matmul %137, %125, %cst_82 {dimension_numbers = #tpu.dot_dimension_numbers<[1], [0], [0], [1], [0, 0, 1, 1], [], []>} : vector<8x8xbf16>, vector<8x32xbf16>, vector<8x32xf32> -> vector<8x32xf32>
    %139 = vector.broadcast %136 : vector<8x1xf32> to vector<8x32xf32>
    %140 = arith.mulf %138, %139 : vector<8x32xf32>
    %141 = arith.truncf %140 : vector<8x32xf32> to vector<8x32xbf16>
    %c3_83 = arith.constant 3 : index
    %c0_84 = arith.constant 0 : index
    %c0_85 = arith.constant 0 : index
    %142 = vector.load %arg7[%c3_83, %c0_84, %c0_85] : memref<4x32x128xbf16, #tpu.memory_space<vmem>>, vector<1x32x128xbf16>
    %143 = vector.shape_cast %142 : vector<1x32x128xbf16> to vector<32x128xbf16>
    %cst_86 = arith.constant dense<0.000000e+00> : vector<8x128xf32>
    %144 = tpu.matmul %141, %143, %cst_86 {dimension_numbers = #tpu.dot_dimension_numbers<[1], [0], [0], [1], [0, 0, 1, 1], [], []>} : vector<8x32xbf16>, vector<32x128xbf16>, vector<8x128xf32> -> vector<8x128xf32>
    %145 = arith.addf %111, %144 : vector<8x128xf32>
    %146 = arith.addf %145, %1 : vector<8x128xf32>
    %cst_87 = arith.constant dense<0.000000e+00> : vector<8xf32>
    %147 = vector.multi_reduction <add>, %146, %cst_87 [1] : vector<8x128xf32> to vector<8xf32>
    %148 = vector.shape_cast %147 : vector<8xf32> to vector<8x1xf32>
    %cst_88 = arith.constant 1.280000e+02 : f32
    %149 = vector.broadcast %cst_88 : f32 to vector<8x1xf32>
    %150 = arith.divf %148, %149 : vector<8x1xf32>
    %151 = vector.broadcast %150 : vector<8x1xf32> to vector<8x128xf32>
    %152 = arith.subf %146, %151 : vector<8x128xf32>
    %153 = arith.mulf %152, %152 : vector<8x128xf32>
    %cst_89 = arith.constant dense<0.000000e+00> : vector<8xf32>
    %154 = vector.multi_reduction <add>, %153, %cst_89 [1] : vector<8x128xf32> to vector<8xf32>
    %155 = vector.shape_cast %154 : vector<8xf32> to vector<8x1xf32>
    %cst_90 = arith.constant 1.280000e+02 : f32
    %156 = vector.broadcast %cst_90 : f32 to vector<8x1xf32>
    %157 = arith.divf %155, %156 : vector<8x1xf32>
    %cst_91 = arith.constant 9.99999974E-6 : f32
    %158 = vector.broadcast %cst_91 : f32 to vector<8x1xf32>
    %159 = arith.addf %157, %158 : vector<8x1xf32>
    %160 = math.rsqrt %159 : vector<8x1xf32>
    %161 = vector.broadcast %160 : vector<8x1xf32> to vector<8x128xf32>
    %162 = arith.mulf %152, %161 : vector<8x128xf32>
    %c0_92 = arith.constant 0 : index
    %c0_93 = arith.constant 0 : index
    %163 = vector.load %arg8[%c0_92, %c0_93] : memref<1x128xf32, #tpu.memory_space<vmem>>, vector<1x128xf32>
    %164 = vector.broadcast %163 : vector<1x128xf32> to vector<8x128xf32>
    %165 = arith.mulf %162, %164 : vector<8x128xf32>
    %c0_94 = arith.constant 0 : index
    %c0_95 = arith.constant 0 : index
    %166 = vector.load %arg9[%c0_94, %c0_95] : memref<1x128xf32, #tpu.memory_space<vmem>>, vector<1x128xf32>
    %167 = vector.broadcast %166 : vector<1x128xf32> to vector<8x128xf32>
    %168 = arith.addf %165, %167 : vector<8x128xf32>
    %169 = arith.truncf %168 : vector<8x128xf32> to vector<8x128xbf16>
    %cst_96 = arith.constant 0.000000e+00 : f32
    %170 = vector.broadcast %cst_96 : f32 to vector<8x128xf32>
    %c0_97 = arith.constant 0 : index
    %c0_98 = arith.constant 0 : index
    %c0_99 = arith.constant 0 : index
    %171 = vector.load %arg10[%c0_97, %c0_98, %c0_99] : memref<1x128x256xbf16, #tpu.memory_space<vmem>>, vector<1x128x256xbf16>
    %172 = vector.shape_cast %171 : vector<1x128x256xbf16> to vector<128x256xbf16>
    %cst_100 = arith.constant dense<0.000000e+00> : vector<8x256xf32>
    %173 = tpu.matmul %169, %172, %cst_100 {dimension_numbers = #tpu.dot_dimension_numbers<[1], [0], [0], [1], [0, 0, 1, 1], [], []>} : vector<8x128xbf16>, vector<128x256xbf16>, vector<8x256xf32> -> vector<8x256xf32>
    %c0_101 = arith.constant 0 : index
    %c0_102 = arith.constant 0 : index
    %c0_103 = arith.constant 0 : index
    %174 = vector.load %arg11[%c0_101, %c0_102, %c0_103] : memref<1x1x256xf32, #tpu.memory_space<vmem>>, vector<1x1x256xf32>
    %175 = vector.shape_cast %174 : vector<1x1x256xf32> to vector<1x256xf32>
    %176 = vector.broadcast %175 : vector<1x256xf32> to vector<8x256xf32>
    %177 = arith.addf %173, %176 : vector<8x256xf32>
    %cst_104 = arith.constant 0.000000e+00 : f32
    %178 = vector.broadcast %cst_104 : f32 to vector<8x256xf32>
    %179 = arith.maximumf %177, %178 : vector<8x256xf32>
    %180 = arith.truncf %179 : vector<8x256xf32> to vector<8x256xbf16>
    %c0_105 = arith.constant 0 : index
    %c0_106 = arith.constant 0 : index
    %c0_107 = arith.constant 0 : index
    %181 = vector.load %arg12[%c0_105, %c0_106, %c0_107] : memref<1x256x128xbf16, #tpu.memory_space<vmem>>, vector<1x256x128xbf16>
    %182 = vector.shape_cast %181 : vector<1x256x128xbf16> to vector<256x128xbf16>
    %cst_108 = arith.constant dense<0.000000e+00> : vector<8x128xf32>
    %183 = tpu.matmul %180, %182, %cst_108 {dimension_numbers = #tpu.dot_dimension_numbers<[1], [0], [0], [1], [0, 0, 1, 1], [], []>} : vector<8x256xbf16>, vector<256x128xbf16>, vector<8x128xf32> -> vector<8x128xf32>
    %184 = arith.addf %170, %183 : vector<8x128xf32>
    %c0_109 = arith.constant 0 : index
    %c0_110 = arith.constant 0 : index
    %185 = vector.load %arg13[%c0_109, %c0_110] : memref<1x128xf32, #tpu.memory_space<vmem>>, vector<1x128xf32>
    %186 = vector.broadcast %185 : vector<1x128xf32> to vector<8x128xf32>
    %187 = arith.addf %184, %186 : vector<8x128xf32>
    %188 = arith.addf %187, %168 : vector<8x128xf32>
    %cst_111 = arith.constant dense<0.000000e+00> : vector<8xf32>
    %189 = vector.multi_reduction <add>, %188, %cst_111 [1] : vector<8x128xf32> to vector<8xf32>
    %190 = vector.shape_cast %189 : vector<8xf32> to vector<8x1xf32>
    %cst_112 = arith.constant 1.280000e+02 : f32
    %191 = vector.broadcast %cst_112 : f32 to vector<8x1xf32>
    %192 = arith.divf %190, %191 : vector<8x1xf32>
    %193 = vector.broadcast %192 : vector<8x1xf32> to vector<8x128xf32>
    %194 = arith.subf %188, %193 : vector<8x128xf32>
    %195 = arith.mulf %194, %194 : vector<8x128xf32>
    %cst_113 = arith.constant dense<0.000000e+00> : vector<8xf32>
    %196 = vector.multi_reduction <add>, %195, %cst_113 [1] : vector<8x128xf32> to vector<8xf32>
    %197 = vector.shape_cast %196 : vector<8xf32> to vector<8x1xf32>
    %cst_114 = arith.constant 1.280000e+02 : f32
    %198 = vector.broadcast %cst_114 : f32 to vector<8x1xf32>
    %199 = arith.divf %197, %198 : vector<8x1xf32>
    %cst_115 = arith.constant 9.99999974E-6 : f32
    %200 = vector.broadcast %cst_115 : f32 to vector<8x1xf32>
    %201 = arith.addf %199, %200 : vector<8x1xf32>
    %202 = math.rsqrt %201 : vector<8x1xf32>
    %203 = vector.broadcast %202 : vector<8x1xf32> to vector<8x128xf32>
    %204 = arith.mulf %194, %203 : vector<8x128xf32>
    %c0_116 = arith.constant 0 : index
    %c0_117 = arith.constant 0 : index
    %205 = vector.load %arg14[%c0_116, %c0_117] : memref<1x128xf32, #tpu.memory_space<vmem>>, vector<1x128xf32>
    %206 = vector.broadcast %205 : vector<1x128xf32> to vector<8x128xf32>
    %207 = arith.mulf %204, %206 : vector<8x128xf32>
    %c0_118 = arith.constant 0 : index
    %c0_119 = arith.constant 0 : index
    %208 = vector.load %arg15[%c0_118, %c0_119] : memref<1x128xf32, #tpu.memory_space<vmem>>, vector<1x128xf32>
    %209 = vector.broadcast %208 : vector<1x128xf32> to vector<8x128xf32>
    %210 = arith.addf %207, %209 : vector<8x128xf32>
    %c0_120 = arith.constant 0 : index
    %c0_121 = arith.constant 0 : index
    %c0_122 = arith.constant 0 : index
    %211 = vector.load %arg16[%c0_120, %c0_121, %c0_122] : memref<1x8x128xf32, #tpu.memory_space<vmem>>, vector<1x8x128xf32>
    %212 = vector.shape_cast %211 : vector<1x8x128xf32> to vector<8x128xf32>
    %213 = vector.shape_cast %210 : vector<8x128xf32> to vector<1x8x128xf32>
    tpu.vector_store %arg16[%c0_120, %c0_121, %c0_122], %213 {strides = array<i32>} : memref<1x8x128xf32, #tpu.memory_space<vmem>>, vector<1x8x128xf32>,
    return
  }
  func.func @transform_0(%arg0: i32, %arg1: i32, %arg2: memref<2xi32, #tpu.memory_space<smem>>) -> (i32, i32, i32) {
    %c0_i32 = arith.constant 0 : i32
    %c0_i32_0 = arith.constant 0 : i32
    %c0_i32_1 = arith.constant 0 : i32
    return %arg0, %c0_i32, %c0_i32_0 : i32, i32, i32
  }
  func.func @transform_1(%arg0: i32, %arg1: i32, %arg2: memref<2xi32, #tpu.memory_space<smem>>) -> (i32, i32, i32) {
    %c0_i32 = arith.constant 0 : i32
    %c0_i32_0 = arith.constant 0 : i32
    %c0_i32_1 = arith.constant 0 : i32
    %c0_i32_2 = arith.constant 0 : i32
    return %c0_i32, %c0_i32_0, %c0_i32_1 : i32, i32, i32
  }
  func.func @transform_2(%arg0: i32, %arg1: i32, %arg2: memref<2xi32, #tpu.memory_space<smem>>) -> (i32, i32, i32) {
    %c0_i32 = arith.constant 0 : i32
    %c0_i32_0 = arith.constant 0 : i32
    %c0_i32_1 = arith.constant 0 : i32
    %c0_i32_2 = arith.constant 0 : i32
    return %c0_i32, %c0_i32_0, %c0_i32_1 : i32, i32, i32
  }
  func.func @transform_3(%arg0: i32, %arg1: i32, %arg2: memref<2xi32, #tpu.memory_space<smem>>) -> (i32, i32, i32) {
    %c0_i32 = arith.constant 0 : i32
    %c0_i32_0 = arith.constant 0 : i32
    %c0_i32_1 = arith.constant 0 : i32
    %c0_i32_2 = arith.constant 0 : i32
    return %c0_i32, %c0_i32_0, %c0_i32_1 : i32, i32, i32
  }
  func.func @transform_4(%arg0: i32, %arg1: i32, %arg2: memref<2xi32, #tpu.memory_space<smem>>) -> (i32, i32, i32) {
    %c0_i32 = arith.constant 0 : i32
    %c0_i32_0 = arith.constant 0 : i32
    %c0_i32_1 = arith.constant 0 : i32
    %c0_i32_2 = arith.constant 0 : i32
    return %c0_i32, %c0_i32_0, %c0_i32_1 : i32, i32, i32
  }
  func.func @transform_5(%arg0: i32, %arg1: i32, %arg2: memref<2xi32, #tpu.memory_space<smem>>) -> (i32, i32) {
    %c0_i32 = arith.constant 0 : i32
    %c0_i32_0 = arith.constant 0 : i32
    %c0_i32_1 = arith.constant 0 : i32
    return %c0_i32, %c0_i32_0 : i32, i32
  }
  func.func @transform_6(%arg0: i32, %arg1: i32, %arg2: memref<2xi32, #tpu.memory_space<smem>>) -> (i32, i32) {
    %c0_i32 = arith.constant 0 : i32
    %c0_i32_0 = arith.constant 0 : i32
    %c0_i32_1 = arith.constant 0 : i32
    return %c0_i32, %c0_i32_0 : i32, i32
  }
  func.func @transform_7(%arg0: i32, %arg1: i32, %arg2: memref<2xi32, #tpu.memory_space<smem>>) -> (i32, i32, i32) {
    %c0_i32 = arith.constant 0 : i32
    %c0_i32_0 = arith.constant 0 : i32
    %c0_i32_1 = arith.constant 0 : i32
    %c0_i32_2 = arith.constant 0 : i32
    return %c0_i32, %c0_i32_0, %c0_i32_1 : i32, i32, i32
  }
  func.func @transform_8(%arg0: i32, %arg1: i32, %arg2: memref<2xi32, #tpu.memory_space<smem>>) -> (i32, i32, i32) {
    %c0_i32 = arith.constant 0 : i32
    %c0_i32_0 = arith.constant 0 : i32
    %c0_i32_1 = arith.constant 0 : i32
    %c0_i32_2 = arith.constant 0 : i32
    return %c0_i32, %c0_i32_0, %c0_i32_1 : i32, i32, i32
  }
  func.func @transform_9(%arg0: i32, %arg1: i32, %arg2: memref<2xi32, #tpu.memory_space<smem>>) -> (i32, i32, i32) {
    %c0_i32 = arith.constant 0 : i32
    %c0_i32_0 = arith.constant 0 : i32
    %c0_i32_1 = arith.constant 0 : i32
    %c0_i32_2 = arith.constant 0 : i32
    return %c0_i32, %c0_i32_0, %c0_i32_1 : i32, i32, i32
  }
  func.func @transform_10(%arg0: i32, %arg1: i32, %arg2: memref<2xi32, #tpu.memory_space<smem>>) -> (i32, i32) {
    %c0_i32 = arith.constant 0 : i32
    %c0_i32_0 = arith.constant 0 : i32
    %c0_i32_1 = arith.constant 0 : i32
    return %c0_i32, %c0_i32_0 : i32, i32
  }
  func.func @transform_11(%arg0: i32, %arg1: i32, %arg2: memref<2xi32, #tpu.memory_space<smem>>) -> (i32, i32) {
    %c0_i32 = arith.constant 0 : i32
    %c0_i32_0 = arith.constant 0 : i32
    %c0_i32_1 = arith.constant 0 : i32
    return %c0_i32, %c0_i32_0 : i32, i32
  }
  func.func @transform_12(%arg0: i32, %arg1: i32, %arg2: memref<2xi32, #tpu.memory_space<smem>>) -> (i32, i32) {
    %c0_i32 = arith.constant 0 : i32
    %c0_i32_0 = arith.constant 0 : i32
    %c0_i32_1 = arith.constant 0 : i32
    return %c0_i32, %c0_i32_0 : i32, i32
  }
  func.func @transform_13(%arg0: i32, %arg1: i32, %arg2: memref<2xi32, #tpu.memory_space<smem>>) -> (i32, i32, i32) {
    %c0_i32 = arith.constant 0 : i32
    %c0_i32_0 = arith.constant 0 : i32
    return %arg0, %arg1, %c0_i32 : i32, i32, i32
  }
}

</mosaic_0001>

<bundles_post_ra>
// kernel: encoder_block.1
= control target key start
LH: loop header
LB: loop body
LE: loop exit
PB: predicated region body
PF: predicated region fallthrough
CT: control target
= control target key end

     0   :  { %s4840_s0 = inlined_call_operand.vmem [shape: s32[2], index: 0, kind: input, shape index: {}]   ;;  %s4841_s1 = inlined_call_operand.vmem [shape: f32[2,8,128], index: 1, kind: input, shape index: {}]   ;;  %s4842_s2 = inlined_call_operand.vmem [shape: bf16[4,128,32], index: 2, kind: input, shape index: {}]   ;;  %s4843_s3 = inlined_call_operand.vmem [shape: bf16[4,128,32], index: 3, kind: input, shape index: {}]   ;;  %s4844_s4 = inlined_call_operand.vmem [shape: bf16[4,128,32], index: 4, kind: input, shape index: {}]   ;;  %s4845_s5 = inlined_call_operand.vmem [shape: bf16[4,32,128], index: 5, kind: input, shape index: {}]   ;;  %s4846_s6 = inlined_call_operand.vmem [shape: f32[1,128], index: 6, kind: input, shape index: {}]   ;;  %s4847_s7 = inlined_call_operand.vmem [shape: f32[1,128], index: 7, kind: input, shape index: {}]   ;;  %s4848_s8 = inlined_call_operand.vmem [shape: bf16[1,128,256], index: 8, kind: input, shape index: {}]   ;;  %s4849_s9 = inlined_call_operand.vmem [shape: f32[1,1,256], index: 9, kind: input, shape index: {}]   ;;  %s4850_s10 = inlined_call_operand.vmem [shape: bf16[1,256,128], index: 10, kind: input, shape index: {}]   ;;  %s4851_s11 = inlined_call_operand.vmem [shape: f32[1,128], index: 11, kind: input, shape index: {}]   ;;  %s4852_s12 = inlined_call_operand.vmem [shape: f32[1,128], index: 12, kind: input, shape index: {}]   ;;  %s4853_s13 = inlined_call_operand.vmem [shape: f32[1,128], index: 13, kind: input, shape index: {}]   ;;  %s4854_s14 = inlined_call_operand.hbm [shape: f32[2,8,128], index: 14, kind: output, shape index: {}]  }
   0x1   :  { %4857 = sst [smem:[#allocation11_spill]] %s4841_s1  ;;  %s19_s15 = sshll.u32 %s4840_s0, 4  ;;  %s20_s15 = int_to_ptr.vmem [resolvable:$true] %s19_s15 }
   0x2   :  { %4858 = sst [smem:[#allocation12_spill]] %s4842_s2  ;;  %s3898_s16 = scalar_lea.vmem %s20_s15, 16 }
   0x3   :  { %p3899_p0 = scmp.ne.s32.totalorder %s20_s15, %s3898_s16  ;;  %p3903_p1 = scmp.lt.s32.totalorder %s20_s15, %s20_s15 }
   0x4   :  { %p3904_p2 = scmp.lt.s32.totalorder %s3898_s16, %s3898_s16 }
   0x6   :  { %p3905_p3 = por %p3904_p2, %p3903_p1 }
   0x8   :  { %p3906_p4 = pnand %p3905_p3, %p3899_p0 }
   0xa   :  { %3909 = shalt.err (!%p3906_p4)  }
   0xb   :  { %s3992_s17 = smov [#allocation3]  }
   0xc   :  { %22 = dma.vmem_to_smem %s20_s15, 16, %s3992_s17, [#allocation2] }
   0xd   :  { %3962 = dma.done.wait [#allocation2], 16 }
   0xe   :  { %3963 = vsyncadd [#allocation2], 4294967280 }
   0xf   :  { %24 = sfence }
  0x10   :  { %25 = vsyncpa [#allocation5], 0 }
  0x11   :  { %27 = vsyncpa [#allocation5 + $0x1], 0  ;;  %s4075_s18 = smov 0   ;;  %s4077_s19 = smov 0  }
  0x12   :  { %s4079_s0 = smov 0   ;;  %s4081_s20 = smov 0  }
  0x13   :  { %s4083_s21 = smov 0   ;;  %s4085_s22 = smov 0  }
  0x14 LB: > { %4859 = sst [smem:[#allocation8_spill]] %s3986_s21  ;;  %s2876_s23 = sadd.s32 4294967295, %s3990_s22   ;;  %s3990_s22 = sphi %s4085_s22, %s33_s22   ;;  %s3986_s21 = sphi %s4083_s21, %s4870_s21   ;;  %s3982_s20 = sphi %s4081_s20, %s4869_s20   ;;  %s3978_s0 = sphi %s4079_s0, %s4873_s0   ;;  %s3974_s19 = sphi %s4077_s19, %s4872_s19   ;;  %s3970_s18 = sphi %s4075_s18, %s4871_s18  }
  0x15   : > { %s2877_s24 = sadd.s32 4294967294, %s3990_s22   ;;  %s45_s25 = sadd.s32 1, %s3986_s21 }
  0x16   : > { %s332_s26 = sadd.s32 1, %s3978_s0  ;;  %p47_p5 = scmp.ge.s32.totalorder %s45_s25, 2 }
  0x17   : > { %p342_p6 = scmp.ne.s32.totalorder %s3978_s0, %s3974_s19  ;;  %p343_p7 = scmp.eq.s32.totalorder %s2876_s23, 1 }
  0x18   : > { %p348_p8 = scmp.ne.s32.totalorder %s3974_s19, %s3970_s18  ;;  %s4875_s25 = smov (%p47_p5, %s45_s25), 0 }
  0x19   : > { %4860 = sst [smem:[#allocation9_spill]] %s4875_s25  ;;  %p4115_p9 = por %p343_p7, %p342_p6 }
  0x1a   : > { %p349_p10 = scmp.eq.s32.totalorder %s2877_s24, 1  ;;  %s327_s28 = ssub.s32 %s3986_s21, %s4875_s25 }
  0x1b   : > { %p2880_p11 = scmp.ge.s32.totalorder %s3990_s22, 1  ;;  %p330_p12 = scmp.eq.s32.totalorder %s327_s28, 0 }
  0x1c   : > { %p4122_p13 = por %p349_p10, %p348_p8  ;;  %p410_p0 = scmp.lt.s32.totalorder %s3990_s22, 3 }
  0x1d   : > { %s4128_s30 = scalar_select %p330_p12, %s3978_s0, %s332_s26  }
  0x1e   : > { %p411_p1 = pnand %p2880_p11, %p410_p0 }
  0x1f   : > { %4863 = sst [smem:[#allocation10_spill]] %s4128_s30  ;;  %v3733_v0 = vld [vmem:[%s4843_s3] sm:$0xff] (!%p411_p1)   ;;  %v3993_v1 = vmov (!%p411_p1), 0.0   ;;  %s4864_s2 = sld [smem:[#allocation12_spill]] (!%p411_p1)  ;;  %v3735_v3 = vld [vmem:[%s4843_s3 + $0x8] sm:$0xff] (!%p411_p1)   ;;  %vm3994_vm0 = vmmov (!%p411_p1), 0   ;;  %v461_v39 = vlaneseq (!%p411_p1) }
  0x20   : > { %414 = sbr.rel (%p411_p1) target bundleno = 4463 (0x116f), region = 72  ;;  %3374 = vmatprep.subr.bf16.mxu1 (!%p411_p1), %v3993_v1  ;;  %3354 = vmatprep.subr.bf16.mxu0 (!%p411_p1), %v3993_v1  ;;  %v3737_v5 = vld [vmem:[%s4843_s3 + $0x10] sm:$0xff] (!%p411_p1)   ;;  %p453_p2 = scmp.lt.s32.totalorder (!%p411_p1), %s3982_s20, 1  ;;  %v3739_v7 = vld [vmem:[%s4843_s3 + $0x18] sm:$0xff] (!%p411_p1)   ;;  %v3741_v9 = vld [vmem:[%s4843_s3 + $0x20] sm:$0xff] (!%p411_p1)   ;;  %vm781_vm1 = vcmask (!%p411_p1), 261120  }
  0x21   : > { %3375 = vmatpush3.bf16.msra.mxu1 (!%p411_p1), %v3733_v0  ;;  %3390 = vmatprep.mubr.msk.bf16.mxu1 (!%p411_p1), %vm3994_vm0, %v3993_v1  ;;  %v3743_v11 = vld [vmem:[%s4843_s3 + $0x28] sm:$0xff] (!%p411_p1)   ;;  %v3745_v13 = vld [vmem:[%s4843_s3 + $0x30] sm:$0xff] (!%p411_p1)   ;;  %s4865_s1 = sld [smem:[#allocation11_spill]] (!%p411_p1)  ;;  %v3747_v15 = vld [vmem:[%s4843_s3 + $0x38] sm:$0xff] (!%p411_p1)   ;;  %v462_v40 = vand.u32 (!%p411_p1), 127, %v461_v39  ;;  %vm829_vm3 = vcmask (!%p411_p1), 64512  }
  0x22   : > { %3376 = vmatprep.subr.bf16.mxu1 (!%p411_p1), %v3993_v1  ;;  %3370 = vmatprep.mubr.msk.bf16.mxu0 (!%p411_p1), %vm3994_vm0, %v3993_v1  ;;  %v3749_v19 = vld [vmem:[%s4844_s4] sm:$0xff] (!%p411_p1)   ;;  %v3750_v20 = vld [vmem:[%s4844_s4 + $0x8] sm:$0xff] (!%p411_p1)   ;;  %v3751_v21 = vld [vmem:[%s4844_s4 + $0x10] sm:$0xff] (!%p411_p1)   ;;  %s460_s23 = sld [smem:[#allocation3 + %s3982_s20]] (!%p411_p1)  ;;  %vm844_vm4 = vcmask (!%p411_p1), 1043456   ;;  %s450_s24 = sand.u32 (!%p411_p1), 1, %s3974_s19  }
  0x23   : > { %v3752_v22 = vld [vmem:[%s4844_s4 + $0x18] sm:$0xff] (!%p411_p1)   ;;  %v3753_v23 = vld [vmem:[%s4844_s4 + $0x20] sm:$0xff] (!%p411_p1)   ;;  %v3754_v24 = vld [vmem:[%s4844_s4 + $0x28] sm:$0xff] (!%p411_p1)   ;;  %s2794_s26 = scalar_lea.sflag (!%p411_p1), [#allocation5], %s450_s24 }
  0x24   : > { %v3755_v25 = vld [vmem:[%s4844_s4 + $0x30] sm:$0xff] (!%p411_p1)   ;;  %v3756_v26 = vld [vmem:[%s4844_s4 + $0x38] sm:$0xff] (!%p411_p1)   ;;  %v3757_v50 = vld [vmem:[%s4843_s3 + $0x40] sm:$0xff] (!%p411_p1)  }
  0x25   : > { %v3734_v2 = vld [vmem:[%s4864_s2] sm:$0xff] (!%p411_p1)   ;;  %v3736_v4 = vld [vmem:[%s4864_s2 + $0x8] sm:$0xff] (!%p411_p1)   ;;  %3377 = vmatpush3.bf16.msra.mxu1 (!%p411_p1), %v3735_v3  ;;  %v3738_v6 = vld [vmem:[%s4864_s2 + $0x10] sm:$0xff] (!%p411_p1)  }
  0x26   : > { %3355 = vmatpush3.bf16.msra.mxu0 (!%p411_p1), %v3734_v2  ;;  %3378 = vmatprep.subr.bf16.mxu1 (!%p411_p1), %v3993_v1  ;;  %v3740_v8 = vld [vmem:[%s4864_s2 + $0x18] sm:$0xff] (!%p411_p1)   ;;  %v3742_v10 = vld [vmem:[%s4864_s2 + $0x20] sm:$0xff] (!%p411_p1)   ;;  %v3744_v12 = vld [vmem:[%s4864_s2 + $0x28] sm:$0xff] (!%p411_p1)  }
  0x27   : > { %3356 = vmatprep.subr.bf16.mxu0 %v3993_v1  ;;  %s454_s17 = scalar_select %p453_p2, %s3982_s20, 1  ;;  %v3746_v14 = vld [vmem:[%s4864_s2 + $0x30] sm:$0xff]   ;;  %v3748_v17 = vld [vmem:[%s4864_s2 + $0x38] sm:$0xff]   ;;  %v3758_v54 = vld [vmem:[%s4843_s3 + $0x48] sm:$0xff]  }
  0x28   : > { %v463_v41 = vstv %s460_s23  ;;  %v3759_v57 = vld [vmem:[%s4843_s3 + $0x50] sm:$0xff]   ;;  %v3761_v58 = vld [vmem:[%s4843_s3 + $0x58] sm:$0xff]   ;;  %v3763_v59 = vld [vmem:[%s4843_s3 + $0x60] sm:$0xff]  }
  0x29   : > { %3379 = vmatpush3.bf16.msra.mxu1 %v3737_v5  ;;  %s2882_s16 = sshll.u32 %s454_s17, 3  ;;  %vm4258_vm2 = vcmp.lt.s32.totalorder %v462_v40, %v463_v41  ;;  %v3765_v60 = vld [vmem:[%s4843_s3 + $0x68] sm:$0xff]   ;;  %v3767_v61 = vld [vmem:[%s4843_s3 + $0x70] sm:$0xff]   ;;  %v3769_v62 = vld [vmem:[%s4843_s3 + $0x78] sm:$0xff]  }
  0x2a   : > { %3357 = vmatpush3.bf16.msra.mxu0 %v3736_v4  ;;  %3380 = vmatprep.subr.bf16.mxu1 %v3993_v1  ;;  %s4193_s15 = scalar_lea.vmem %s4865_s1, %s2882_s16  ;;  %v3760_v4 = vld [vmem:[%s4864_s2 + $0x40] sm:$0xff]   ;;  %s2881_s16 = sshll.u32 %s450_s24, 3 }
  0x2b   : > { %3358 = vmatprep.subr.bf16.mxu0 %v3993_v1  ;;  %v458_v16 = vld [vmem:[%s4193_s15] sm:$0xff]  ;;  %s452_s21 = scalar_lea.vmem [#allocation4], %s2881_s16 }
  0x2c   : > { %v4206_v18 = vpack.c.bf16 %v458_v16, %v458_v16  ;;  %v3775_v16 = vld [vmem:[%s4844_s4 + $0x50] sm:$0xff]   ;;  %s2808_s30 = sshll.u32 %s452_s21, 4  ;;  %s4795_s30 = int_to_ptr.vmem [resolvable:$true] %s2808_s30 }
  0x2d   : > { %3381 = vmatpush3.bf16.msra.mxu1 %v3739_v7  ;;  %v3762_v7 = vld [vmem:[%s4864_s2 + $0x48] sm:$0xff]   ;;  %s3910_s28 = scalar_lea.vmem %s4795_s30, 128 }
  0x2e   : > { %3359 = vmatpush3.bf16.msra.mxu0 %v3738_v6  ;;  %3382 = vmatprep.subr.bf16.mxu1 %v3993_v1  ;;  %p3911_p3 = scmp.ne.s32.totalorder %s4795_s30, %s3910_s28 }
  0x2f   : > { %3360 = vmatprep.subr.bf16.mxu0 %v3993_v1 }
  0x30   : > { %p3912_p4 = pnand %p3911_p3, %p4115_p9 }
  0x31   : > { %3383 = vmatpush3.bf16.msra.mxu1 %v3741_v9  ;;  %v3766_v9 = vld [vmem:[%s4864_s2 + $0x58] sm:$0xff]  }
  0x32   : > { %3361 = vmatpush3.bf16.msra.mxu0 %v3740_v8  ;;  %3384 = vmatprep.subr.bf16.mxu1 %v3993_v1  ;;  %v3764_v8 = vld [vmem:[%s4864_s2 + $0x50] sm:$0xff]   ;;  %p3913_p5 = pneg %p3912_p4 }
  0x33   : > { %3362 = vmatprep.subr.bf16.mxu0 %v3993_v1 }
  0x35   : > { %3385 = vmatpush3.bf16.msra.mxu1 %v3743_v11  ;;  %v3770_v11 = vld [vmem:[%s4864_s2 + $0x68] sm:$0xff]  }
  0x36   : > { %3363 = vmatpush3.bf16.msra.mxu0 %v3742_v10  ;;  %3386 = vmatprep.subr.bf16.mxu1 %v3993_v1  ;;  %v3768_v10 = vld [vmem:[%s4864_s2 + $0x60] sm:$0xff]  }
  0x37   : > { %3364 = vmatprep.subr.bf16.mxu0 %v3993_v1 }
  0x39   : > { %3387 = vmatpush3.bf16.msra.mxu1 %v3745_v13  ;;  %v3772_v13 = vld [vmem:[%s4864_s2 + $0x78] sm:$0xff]  }
  0x3a   : > { %3365 = vmatpush3.bf16.msra.mxu0 %v3744_v12  ;;  %3388 = vmatprep.subr.bf16.mxu1 %v3993_v1  ;;  %v3771_v12 = vld [vmem:[%s4864_s2 + $0x70] sm:$0xff]  }
  0x3b   : > { %3366 = vmatprep.subr.bf16.mxu0 %v3993_v1 }
  0x3d   : > { %3389 = vmatpush3.bf16.msra.mxu1 %v3747_v15  ;;  %v3774_v15 = vld [vmem:[%s4844_s4 + $0x48] sm:$0xff]  }
  0x3e   : > { %3367 = vmatpush3.bf16.msra.mxu0 %v3746_v14  ;;  %3414 = vmatprep.subr.bf16.mxu1 %v3993_v1  ;;  %v3773_v14 = vld [vmem:[%s4844_s4 + $0x40] sm:$0xff]  }
  0x3f   : > { %3368 = vmatprep.subr.bf16.mxu0 %v3993_v1 }
  0x40   : > { %3391 = vmatmul.mubr.bf16.vlgmr.msra.gmra.mrb[0].mxu1 %v4206_v18 }
  0x41   : > { %3416 = vmatprep.mubr.msk.bf16.mxu1 %vm3994_vm0, %v3993_v1 }
  0x42   : > { %3369 = vmatpush3.bf16.msra.mxu0 %v3748_v17  ;;  %v3776_v17 = vld [vmem:[%s4844_s4 + $0x58] sm:$0xff]  }
  0x43   : > { %3394 = vmatprep.subr.bf16.mxu0 %v3993_v1 }
  0x45   : > { %3371 = vmatmul.mubr.bf16.vlgmr.msra.gmra.mrb[0].mxu0 %v4206_v18 }
  0x46   : > { %3410 = vmatprep.mubr.msk.bf16.mxu0 %vm3994_vm0, %v3993_v1  ;;  %3395 = vmatpush3.bf16.msra.mxu0 %v3749_v19  ;;  %v3777_v19 = vld [vmem:[%s4844_s4 + $0x60] sm:$0xff]  }
  0x47   : > { %3396 = vmatprep.subr.bf16.mxu0 %v3993_v1 }
  0x4a   : > { %3397 = vmatpush3.bf16.msra.mxu0 %v3750_v20  ;;  %v3778_v20 = vld [vmem:[%s4844_s4 + $0x68] sm:$0xff]  }
  0x4b   : > { %3398 = vmatprep.subr.bf16.mxu0 %v3993_v1 }
  0x4e   : > { %3399 = vmatpush3.bf16.msra.mxu0 %v3751_v21  ;;  %v3779_v21 = vld [vmem:[%s4844_s4 + $0x70] sm:$0xff]  }
  0x4f   : > { %3400 = vmatprep.subr.bf16.mxu0 %v3993_v1 }
  0x52   : > { %3401 = vmatpush3.bf16.msra.mxu0 %v3752_v22  ;;  %v3780_v22 = vld [vmem:[%s4844_s4 + $0x78] sm:$0xff]  }
  0x53   : > { %3402 = vmatprep.subr.bf16.mxu0 %v3993_v1 }
  0x56   : > { %3403 = vmatpush3.bf16.msra.mxu0 %v3753_v23  ;;  %v3781_v23 = vld [vmem:[%s4845_s5] sm:$0xff]  }
  0x57   : > { %3404 = vmatprep.subr.bf16.mxu0 %v3993_v1 }
  0x5a   : > { %3405 = vmatpush3.bf16.msra.mxu0 %v3754_v24  ;;  %v3782_v24 = vld [vmem:[%s4845_s5 + $0x8] sm:$0xff]  }
  0x5b   : > { %3406 = vmatprep.subr.bf16.mxu0 %v3993_v1 }
  0x5e   : > { %3407 = vmatpush3.bf16.msra.mxu0 %v3755_v25 }
  0x5f   : > { %3408 = vmatprep.subr.bf16.mxu0 %v3993_v1 }
  0x62   : > { %3409 = vmatpush3.bf16.msra.mxu0 %v3756_v26 }
  0x63   : > { %3446 = vmatprep.subr.bf16.mxu0 %v3993_v1 }
  0x65   : > { %3411 = vmatmul.mubr.bf16.vlgmr.msra.gmra.mrb[4].mxu0 %v4206_v18 }
  0x66   : > { %3462 = vmatprep.mubr.msk.bf16.mxu0 %vm3994_vm0, %v3993_v1  ;;  %3447 = vmatpush3.bf16.msra.mxu0 %v3757_v50 }
  0x67   : > { %3448 = vmatprep.subr.bf16.mxu0 %v3993_v1 }
  0x6a   : > { %3449 = vmatpush3.bf16.msra.mxu0 %v3758_v54 }
  0x6b   : > { %3450 = vmatprep.subr.bf16.mxu0 %v3993_v1 }
  0x6e   : > { %3451 = vmatpush3.bf16.msra.mxu0 %v3759_v57 }
  0x6f   : > { %3452 = vmatprep.subr.bf16.mxu0 %v3993_v1 }
  0x72   : > { %3453 = vmatpush3.bf16.msra.mxu0 %v3761_v58 }
  0x73   : > { %3454 = vmatprep.subr.bf16.mxu0 %v3993_v1 }
  0x76   : > { %3455 = vmatpush3.bf16.msra.mxu0 %v3763_v59 }
  0x77   : > { %3456 = vmatprep.subr.bf16.mxu0 %v3993_v1 }
  0x7a   : > { %3457 = vmatpush3.bf16.msra.mxu0 %v3765_v60 }
  0x7b   : > { %3458 = vmatprep.subr.bf16.mxu0 %v3993_v1 }
  0x7e   : > { %3459 = vmatpush3.bf16.msra.mxu0 %v3767_v61 }
  0x7f   : > { %3460 = vmatprep.subr.bf16.mxu0 %v3993_v1 }
  0x82   : > { %3461 = vmatpush3.bf16.msra.mxu0 %v3769_v62 }
  0x83   : > { %3486 = vmatprep.subr.bf16.mxu0 %v3993_v1 }
  0x85   : > { %3463 = vmatmul.mubr.bf16.vlgmr.msra.gmra.mrb[8].mxu0 %v4206_v18 }
  0x86   : > { %3488 = vmatprep.mubr.msk.bf16.mxu0 %vm3994_vm0, %v3993_v1 }
 0x113   : > { %v669_v27 = vpop.f32.mrb[0].mxu1 }
 0x114   : > { %v675_v28 = vpack.c.bf16 %v669_v27, %v669_v27  ;;  %v3392_v29 = vpop.f32.mrb[1].mxu1 }
 0x115   : > { %v672_v31 = vpop.f32.mrb[2].mxu1 }
 0x116   : > { %v786_v33 = vsel %vm781_vm1, %v675_v28, 0  ;;  %v3393_v34 = vpop.f32.mrb[3].mxu1 }
 0x117   : > { %3415 = vmatpush3.bf16.xpose.msra.mxu1 %v786_v33 }
 0x118   : > { %v563_v30 = vpop.f32.mrb[0].mxu0  ;;  %3420 = vmatprep.subr.bf16.mxu1 %v3993_v1 }
 0x119   : > { %v3372_v32 = vpop.f32.mrb[1].mxu0  ;;  %v569_v35 = vmul.f32 0.17677669, %v563_v30 }
 0x11a   : > { %v566_v36 = vpop.f32.mrb[2].mxu0 }
 0x11b   : > { %v3373_v37 = vpop.f32.mrb[3].mxu0  ;;  %v570_v38 = vpack.c.bf16 %v569_v35, %v569_v35 }
 0x11e   : > { %3417 = vmatmul.mubr.msk.bf16.vlgmr.msra.gmra.mrb[4].mxu1 %vm781_vm1, %v570_v38 }
 0x11f   : > { %3422 = vmatprep.mubr.msk.bf16.mxu1 %vm3994_vm0, %v3993_v1 }
 0x138   : > { %v774_v49 = vpop.f32.mrb[4].mxu0 }
 0x139   : > { %v780_v51 = vpack.c.bf16 %v774_v49, %v774_v49  ;;  %v3412_v52 = vpop.f32.mrb[5].mxu0 }
 0x13a   : > { %v777_v53 = vpop.f32.mrb[6].mxu0 }
 0x13b   : > { %v846_v55 = vsel %vm844_vm4, %v780_v51, 0  ;;  %v3413_v56 = vpop.f32.mrb[7].mxu0 }
 0x13c   : > { %3421 = vmatpush3.bf16.msra.mxu1 %v846_v55 }
 0x13d   : > { %3426 = vmatprep.subr.bf16.mxu1 %v3993_v1 }
 0x158   : > { %v1100_v25 = vpop.f32.mrb[8].mxu0 }
 0x159   : > { %v1106_v26 = vpack.c.bf16 %v1100_v25, %v1100_v25  ;;  %v3464_v27 = vpop.f32.mrb[9].mxu0 }
 0x15a   : > { %v1103_v28 = vpop.f32.mrb[10].mxu0  ;;  %v3792_v27 = vld [vmem:[%s4864_s2 + $0x90] sm:$0xff]  }
 0x15b   : > { %v1217_v29 = vsel %vm781_vm1, %v1106_v26, 0  ;;  %v3465_v30 = vpop.f32.mrb[11].mxu0  ;;  %v3790_v26 = vld [vmem:[%s4864_s2 + $0x88] sm:$0xff]   ;;  %v3794_v28 = vld [vmem:[%s4864_s2 + $0x98] sm:$0xff]  }
 0x15c   : > { %3487 = vmatpush3.bf16.xpose.msra.mxu0 %v1217_v29  ;;  %v3796_v29 = vld [vmem:[%s4864_s2 + $0xa0] sm:$0xff]   ;;  %v3798_v30 = vld [vmem:[%s4864_s2 + $0xa8] sm:$0xff]  }
 0x15d   : > { %3492 = vmatprep.subr.bf16.mxu0 %v3993_v1 }
 0x1f1   : > { %v822_v43 = vpop.f32.mrb[4].mxu1 }
 0x1f2   : > { %v828_v44 = vsel %vm4258_vm2, %v822_v43, -1000000.0  ;;  %v3418_v45 = vpop.f32.mrb[5].mxu1 }
 0x1f3   : > { %v825_v46 = vpop.f32.mrb[6].mxu1  ;;  %v830_v47 = vsel %vm829_vm3, %v828_v44, -inf }
 0x1f4   : > { %831 = vmax.xlane.f32.xlu0 %v830_v47  ;;  %v3419_v48 = vpop.f32.mrb[7].mxu1 }
 0x281   : > { %v832_v63 = vpop.xlane.xlu0 %831 }
 0x282   : > { %v833_v0 = vsub.f32 %v828_v44, %v832_v63 }
 0x284   : > { %v834_v2 = vmul.f32 1.442695, %v833_v0 }
 0x286   : > { %3877 = vpow2.f32 %v834_v2 }
 0x290   : > { %v3878_v3 = vpop.eup %3877 }
 0x291   : > { %v836_v5 = vsel %vm829_vm3, %v3878_v3, 0.0  ;;  %v840_v6 = vpack.c.bf16 %v3878_v3, %v3878_v3 }
 0x292   : > { %837 = vadd.xlane.f32.xlu1 %v836_v5 }
 0x293   : > { %3423 = vmatmul.mubr.msk.bf16.vlgmr.msra.gmra.mrb[8].mxu1 %vm829_vm3, %v840_v6  ;;  %v3783_v6 = vld [vmem:[%s4843_s3 + $0x80] sm:$0xff]  }
 0x294   : > { %3427 = vmatpush3.bf16.msra.mxu1 %v3760_v4  ;;  %3442 = vmatprep.mubr.msk.bf16.mxu1 %vm3994_vm0, %v3993_v1 }
 0x295   : > { %3428 = vmatprep.subr.bf16.mxu1 %v3993_v1 }
 0x298   : > { %3429 = vmatpush3.bf16.msra.mxu1 %v3762_v7  ;;  %v3784_v7 = vld [vmem:[%s4845_s5 + $0x10] sm:$0xff]  }
 0x299   : > { %3430 = vmatprep.subr.bf16.mxu1 %v3993_v1 }
 0x29c   : > { %3431 = vmatpush3.bf16.msra.mxu1 %v3764_v8  ;;  %v3785_v8 = vld [vmem:[%s4843_s3 + $0x88] sm:$0xff]  }
 0x29d   : > { %3432 = vmatprep.subr.bf16.mxu1 %v3993_v1 }
 0x2a0   : > { %3433 = vmatpush3.bf16.msra.mxu1 %v3766_v9  ;;  %v3786_v9 = vld [vmem:[%s4845_s5 + $0x18] sm:$0xff]  }
 0x2a1   : > { %3434 = vmatprep.subr.bf16.mxu1 %v3993_v1 }
 0x2a4   : > { %3435 = vmatpush3.bf16.msra.mxu1 %v3768_v10  ;;  %v3787_v10 = vld [vmem:[%s4843_s3 + $0x90] sm:$0xff]  }
 0x2a5   : > { %3436 = vmatprep.subr.bf16.mxu1 %v3993_v1 }
 0x2a8   : > { %3437 = vmatpush3.bf16.msra.mxu1 %v3770_v11  ;;  %v3789_v11 = vld [vmem:[%s4843_s3 + $0x98] sm:$0xff]  }
 0x2a9   : > { %3438 = vmatprep.subr.bf16.mxu1 %v3993_v1 }
 0x2ac   : > { %3439 = vmatpush3.bf16.msra.mxu1 %v3771_v12  ;;  %v3791_v12 = vld [vmem:[%s4843_s3 + $0xa0] sm:$0xff]  }
 0x2ad   : > { %3440 = vmatprep.subr.bf16.mxu1 %v3993_v1 }
 0x2b0   : > { %3441 = vmatpush3.bf16.msra.mxu1 %v3772_v13  ;;  %v3793_v13 = vld [vmem:[%s4843_s3 + $0xa8] sm:$0xff]  }
 0x2b1   : > { %3466 = vmatprep.subr.bf16.mxu1 %v3993_v1 }
 0x2b3   : > { %3443 = vmatmul.mubr.bf16.vlgmr.msra.gmra.mrb[12].mxu1 %v4206_v18 }
 0x2b4   : > { %3467 = vmatpush3.bf16.msra.mxu1 %v3773_v14  ;;  %3482 = vmatprep.mubr.msk.bf16.mxu1 %vm3994_vm0, %v3993_v1  ;;  %v3795_v14 = vld [vmem:[%s4843_s3 + $0xb0] sm:$0xff]  }
 0x2b5   : > { %3468 = vmatprep.subr.bf16.mxu1 %v3993_v1 }
 0x2b8   : > { %3469 = vmatpush3.bf16.msra.mxu1 %v3774_v15  ;;  %v3797_v15 = vld [vmem:[%s4843_s3 + $0xb8] sm:$0xff]  }
 0x2b9   : > { %3470 = vmatprep.subr.bf16.mxu1 %v3993_v1 }
 0x2bc   : > { %3471 = vmatpush3.bf16.msra.mxu1 %v3775_v16 }
 0x2bd   : > { %3472 = vmatprep.subr.bf16.mxu1 %v3993_v1 }
 0x2c0   : > { %3473 = vmatpush3.bf16.msra.mxu1 %v3776_v17 }
 0x2c1   : > { %3474 = vmatprep.subr.bf16.mxu1 %v3993_v1 }
 0x2c4   : > { %3475 = vmatpush3.bf16.msra.mxu1 %v3777_v19 }
 0x2c5   : > { %3476 = vmatprep.subr.bf16.mxu1 %v3993_v1 }
 0x2c8   : > { %3477 = vmatpush3.bf16.msra.mxu1 %v3778_v20 }
 0x2c9   : > { %3478 = vmatprep.subr.bf16.mxu1 %v3993_v1 }
 0x2cc   : > { %3479 = vmatpush3.bf16.msra.mxu1 %v3779_v21 }
 0x2cd   : > { %3480 = vmatprep.subr.bf16.mxu1 %v3993_v1 }
 0x2d0   : > { %3481 = vmatpush3.bf16.msra.mxu1 %v3780_v22 }
 0x2d1   : > { %3506 = vmatprep.subr.bf16.mxu1 %v3993_v1 }
 0x2d3   : > { %3483 = vmatmul.mubr.bf16.vlgmr.msra.gmra.mrb[16].mxu1 %v4206_v18 }
 0x2d4   : > { %3507 = vmatpush3.bf16.msra.mxu1 %v3781_v23  ;;  %3510 = vmatprep.mubr.msk.bf16.mxu1 %vm3994_vm0, %v3993_v1  ;;  %v3788_v23 = vld [vmem:[%s4864_s2 + $0x80] sm:$0xff]  }
 0x2d5   : > { %3508 = vmatprep.subr.bf16.mxu1 %v3993_v1 }
 0x2d8   : > { %3509 = vmatpush3.bf16.msra.mxu1 %v3782_v24 }
 0x2d9   : > { %3534 = vmatprep.subr.bf16.mxu1 %v3993_v1 }
 0x31f   : > { %v838_v31 = vpop.xlane.xlu1 %837 }
 0x320   : > { %3879 = vrcp.f32 %v838_v31  ;;  %v3799_v31 = vld [vmem:[%s4864_s2 + $0xb0] sm:$0xff]  }
 0x32a   : > { %v3880_v32 = vpop.eup %3879 }
 0x366   : > { %v882_v33 = vpop.f32.mrb[8].mxu1 }
 0x367   : > { %v888_v34 = vmul.f32 %v3880_v32, %v882_v33  ;;  %v3424_v35 = vpop.f32.mrb[9].mxu1  ;;  %v3800_v32 = vld [vmem:[%s4864_s2 + $0xb8] sm:$0xff]  }
 0x368   : > { %v885_v36 = vpop.f32.mrb[10].mxu1 }
 0x369   : > { %v889_v37 = vpack.c.bf16 %v888_v34, %v888_v34  ;;  %v3425_v38 = vpop.f32.mrb[11].mxu1 }
 0x36b   : > { %3511 = vmatmul.mubr.msk.bf16.vlgmr.msra.gmra.mrb[20].mxu1 %vm781_vm1, %v889_v37 }
 0x36c   : > { %3550 = vmatprep.mubr.msk.bf16.mxu1 %vm3994_vm0, %v3993_v1  ;;  %3535 = vmatpush3.bf16.msra.mxu1 %v3783_v6 }
 0x36d   : > { %3536 = vmatprep.subr.bf16.mxu1 %v3993_v1 }
 0x370   : > { %3537 = vmatpush3.bf16.msra.mxu1 %v3785_v8 }
 0x371   : > { %3538 = vmatprep.subr.bf16.mxu1 %v3993_v1 }
 0x374   : > { %3539 = vmatpush3.bf16.msra.mxu1 %v3787_v10 }
 0x375   : > { %3540 = vmatprep.subr.bf16.mxu1 %v3993_v1 }
 0x378   : > { %3541 = vmatpush3.bf16.msra.mxu1 %v3789_v11 }
 0x379   : > { %3542 = vmatprep.subr.bf16.mxu1 %v3993_v1 }
 0x37c   : > { %3543 = vmatpush3.bf16.msra.mxu1 %v3791_v12 }
 0x37d   : > { %3544 = vmatprep.subr.bf16.mxu1 %v3993_v1 }
 0x380   : > { %3545 = vmatpush3.bf16.msra.mxu1 %v3793_v13 }
 0x381   : > { %3546 = vmatprep.subr.bf16.mxu1 %v3993_v1 }
 0x384   : > { %3547 = vmatpush3.bf16.msra.mxu1 %v3795_v14 }
 0x385   : > { %3548 = vmatprep.subr.bf16.mxu1 %v3993_v1 }
 0x386   : > { %v993_v40 = vpop.f32.mrb[12].mxu1 }
 0x387   : > { %v999_v41 = vmul.f32 0.17677669, %v993_v40  ;;  %v3444_v43 = vpop.f32.mrb[13].mxu1  ;;  %v3801_v40 = vld [vmem:[%s4844_s4 + $0x80] sm:$0xff]  }
 0x388   : > { %v996_v44 = vpop.f32.mrb[14].mxu1  ;;  %3549 = vmatpush3.bf16.msra.mxu1 %v3797_v15  ;;  %v3803_v43 = vld [vmem:[%s4844_s4 + $0x90] sm:$0xff]   ;;  %v3809_v15 = vld [vmem:[%s4843_s3 + $0xc0] sm:$0xff]  }
 0x389   : > { %v1000_v45 = vpack.c.bf16 %v999_v41, %v999_v41  ;;  %v3445_v46 = vpop.f32.mrb[15].mxu1  ;;  %3574 = vmatprep.subr.bf16.mxu1 %v3993_v1  ;;  %v3802_v41 = vld [vmem:[%s4844_s4 + $0x88] sm:$0xff]   ;;  %v3804_v44 = vld [vmem:[%s4844_s4 + $0x98] sm:$0xff]  }
 0x38a   : > { %v3806_v46 = vld [vmem:[%s4844_s4 + $0xa8] sm:$0xff]  }
 0x38b   : > { %3489 = vmatmul.mubr.msk.bf16.vlgmr.msra.gmra.mrb[12].mxu0 %vm781_vm1, %v1000_v45  ;;  %3551 = vmatmul.mubr.bf16.vlgmr.msra.gmra.mrb[24].mxu1 %v4206_v18  ;;  %v3805_v45 = vld [vmem:[%s4844_s4 + $0xa0] sm:$0xff]  }
 0x38c   : > { %3494 = vmatprep.mubr.msk.bf16.mxu0 %vm3994_vm0, %v3993_v1  ;;  %3576 = vmatprep.mubr.msk.bf16.mxu1 %vm3994_vm0, %v3993_v1 }
 0x3a6   : > { %v1206_v47 = vpop.f32.mrb[16].mxu1 }
 0x3a7   : > { %v1212_v48 = vpack.c.bf16 %v1206_v47, %v1206_v47  ;;  %v3484_v49 = vpop.f32.mrb[17].mxu1  ;;  %v3807_v47 = vld [vmem:[%s4844_s4 + $0xb0] sm:$0xff]  }
 0x3a8   : > { %v1209_v50 = vpop.f32.mrb[18].mxu1 }
 0x3a9   : > { %v1275_v51 = vsel %vm844_vm4, %v1212_v48, 0  ;;  %v3485_v52 = vpop.f32.mrb[19].mxu1  ;;  %v3808_v48 = vld [vmem:[%s4844_s4 + $0xb8] sm:$0xff]  }
 0x3aa   : > { %3493 = vmatpush3.bf16.msra.mxu0 %v1275_v51 }
 0x3ab   : > { %3498 = vmatprep.subr.bf16.mxu0 %v3993_v1 }
 0x43e   : > { %v4394_v53 = vpop.f32.mrb[20].mxu1 }
 0x43f   : > { %v3512_v54 = vpop.f32.mrb[21].mxu1 }
 0x440   : > { %v1431_v55 = vpop.f32.mrb[22].mxu1 }
 0x441   : > { %v3513_v56 = vpop.f32.mrb[23].mxu1 }
 0x45e   : > { %v1253_v57 = vpop.f32.mrb[12].mxu0  ;;  %v1640_v33 = vpop.f32.mrb[24].mxu1 }
 0x45f   : > { %v1259_v58 = vsel %vm4258_vm2, %v1253_v57, -1000000.0  ;;  %v3490_v59 = vpop.f32.mrb[13].mxu0  ;;  %v1646_v34 = vpack.c.bf16 %v1640_v33, %v1640_v33  ;;  %v3552_v35 = vpop.f32.mrb[25].mxu1 }
 0x460   : > { %v1256_v60 = vpop.f32.mrb[14].mxu0  ;;  %v1260_v61 = vsel %vm829_vm3, %v1259_v58, -inf  ;;  %v1643_v36 = vpop.f32.mrb[26].mxu1  ;;  %v3816_v35 = vld [vmem:[%s4864_s2 + $0xc8] sm:$0xff]  }
 0x461   : > { %1261 = vmax.xlane.f32.xlu0 %v1260_v61  ;;  %v3491_v62 = vpop.f32.mrb[15].mxu0  ;;  %v1757_v37 = vsel %vm781_vm1, %v1646_v34, 0  ;;  %v3553_v38 = vpop.f32.mrb[27].mxu1  ;;  %v3818_v36 = vld [vmem:[%s4864_s2 + $0xd0] sm:$0xff]  }
 0x462   : > { %3575 = vmatpush3.bf16.xpose.msra.mxu1 %v1757_v37  ;;  %v3820_v37 = vld [vmem:[%s4864_s2 + $0xd8] sm:$0xff]   ;;  %v3822_v38 = vld [vmem:[%s4864_s2 + $0xe0] sm:$0xff]  }
 0x463   : > { %3580 = vmatprep.subr.bf16.mxu1 %v3993_v1 }
 0x4ee   : > { %v1262_v63 = vpop.xlane.xlu0 %1261 }
 0x4ef   : > { %v1263_v0 = vsub.f32 %v1259_v58, %v1262_v63 }
 0x4f1   : > { %v1264_v2 = vmul.f32 1.442695, %v1263_v0 }
 0x4f3   : > { %3881 = vpow2.f32 %v1264_v2 }
 0x4fd   : > { %v3882_v3 = vpop.eup %3881 }
 0x4fe   : > { %v1266_v4 = vsel %vm829_vm3, %v3882_v3, 0.0  ;;  %v1270_v5 = vpack.c.bf16 %v3882_v3, %v3882_v3 }
 0x4ff   : > { %1267 = vadd.xlane.f32.xlu1 %v1266_v4 }
 0x500   : > { %3495 = vmatmul.mubr.msk.bf16.vlgmr.msra.gmra.mrb[16].mxu0 %vm829_vm3, %v1270_v5 }
 0x501   : > { %3502 = vmatprep.mubr.msk.bf16.mxu0 %vm3994_vm0, %v3993_v1  ;;  %3499 = vmatpush3.bf16.msra.mxu0 %v3784_v7 }
 0x502   : > { %3500 = vmatprep.subr.bf16.mxu0 %v3993_v1 }
 0x505   : > { %3501 = vmatpush3.bf16.msra.mxu0 %v3786_v9 }
 0x506   : > { %3514 = vmatprep.subr.bf16.mxu0 %v3993_v1 }
 0x58c   : > { %v1268_v16 = vpop.xlane.xlu1 %1267 }
 0x58d   : > { %3883 = vrcp.f32 %v1268_v16  ;;  %v3810_v16 = vld [vmem:[%s4845_s5 + $0x20] sm:$0xff]  }
 0x597   : > { %v3884_v17 = vpop.eup %3883 }
 0x5d3   : > { %v1311_v19 = vpop.f32.mrb[16].mxu0 }
 0x5d4   : > { %v1317_v20 = vmul.f32 %v3884_v17, %v1311_v19  ;;  %v3496_v21 = vpop.f32.mrb[17].mxu0  ;;  %v3811_v17 = vld [vmem:[%s4843_s3 + $0xc8] sm:$0xff]  }
 0x5d5   : > { %v1314_v22 = vpop.f32.mrb[18].mxu0  ;;  %v3812_v19 = vld [vmem:[%s4845_s5 + $0x28] sm:$0xff]   ;;  %v3815_v21 = vld [vmem:[%s4843_s3 + $0xd8] sm:$0xff]  }
 0x5d6   : > { %v1318_v24 = vpack.c.bf16 %v1317_v20, %v1317_v20  ;;  %v3497_v25 = vpop.f32.mrb[19].mxu0  ;;  %v3813_v20 = vld [vmem:[%s4843_s3 + $0xd0] sm:$0xff]   ;;  %v3817_v22 = vld [vmem:[%s4843_s3 + $0xe0] sm:$0xff]  }
 0x5d7   : > { %v3823_v25 = vld [vmem:[%s4843_s3 + $0xf8] sm:$0xff]  }
 0x5d8   : > { %3503 = vmatmul.mubr.msk.bf16.vlgmr.msra.gmra.mrb[20].mxu0 %vm781_vm1, %v1318_v24  ;;  %v3821_v24 = vld [vmem:[%s4843_s3 + $0xf0] sm:$0xff]  }
 0x5d9   : > { %3515 = vmatpush3.bf16.msra.mxu0 %v3788_v23  ;;  %3530 = vmatprep.mubr.msk.bf16.mxu0 %vm3994_vm0, %v3993_v1  ;;  %v3819_v23 = vld [vmem:[%s4843_s3 + $0xe8] sm:$0xff]  }
 0x5da   : > { %3516 = vmatprep.subr.bf16.mxu0 %v3993_v1 }
 0x5dd   : > { %3517 = vmatpush3.bf16.msra.mxu0 %v3790_v26 }
 0x5de   : > { %3518 = vmatprep.subr.bf16.mxu0 %v3993_v1 }
 0x5e1   : > { %3519 = vmatpush3.bf16.msra.mxu0 %v3792_v27 }
 0x5e2   : > { %3520 = vmatprep.subr.bf16.mxu0 %v3993_v1 }
 0x5e5   : > { %3521 = vmatpush3.bf16.msra.mxu0 %v3794_v28 }
 0x5e6   : > { %3522 = vmatprep.subr.bf16.mxu0 %v3993_v1 }
 0x5e9   : > { %3523 = vmatpush3.bf16.msra.mxu0 %v3796_v29 }
 0x5ea   : > { %3524 = vmatprep.subr.bf16.mxu0 %v3993_v1 }
 0x5ed   : > { %3525 = vmatpush3.bf16.msra.mxu0 %v3798_v30 }
 0x5ee   : > { %3526 = vmatprep.subr.bf16.mxu0 %v3993_v1 }
 0x5f1   : > { %3527 = vmatpush3.bf16.msra.mxu0 %v3799_v31 }
 0x5f2   : > { %3528 = vmatprep.subr.bf16.mxu0 %v3993_v1 }
 0x5f5   : > { %3529 = vmatpush3.bf16.msra.mxu0 %v3800_v32  ;;  %v3814_v32 = vld [vmem:[%s4864_s2 + $0xc0] sm:$0xff]  }
 0x5f6   : > { %3554 = vmatprep.subr.bf16.mxu0 %v3993_v1 }
 0x5f8   : > { %3531 = vmatmul.mubr.bf16.vlgmr.msra.gmra.mrb[24].mxu0 %v4206_v18 }
 0x5f9   : > { %3570 = vmatprep.mubr.msk.bf16.mxu0 %vm3994_vm0, %v3993_v1  ;;  %3555 = vmatpush3.bf16.msra.mxu0 %v3801_v40  ;;  %v3824_v40 = vld [vmem:[%s4864_s2 + $0xe8] sm:$0xff]  }
 0x5fa   : > { %3556 = vmatprep.subr.bf16.mxu0 %v3993_v1 }
 0x5fd   : > { %3557 = vmatpush3.bf16.msra.mxu0 %v3802_v41  ;;  %v3825_v41 = vld [vmem:[%s4864_s2 + $0xf0] sm:$0xff]  }
 0x5fe   : > { %3558 = vmatprep.subr.bf16.mxu0 %v3993_v1 }
 0x601   : > { %3559 = vmatpush3.bf16.msra.mxu0 %v3803_v43  ;;  %v3826_v43 = vld [vmem:[%s4864_s2 + $0xf8] sm:$0xff]  }
 0x602   : > { %3560 = vmatprep.subr.bf16.mxu0 %v3993_v1 }
 0x605   : > { %3561 = vmatpush3.bf16.msra.mxu0 %v3804_v44 }
 0x606   : > { %3562 = vmatprep.subr.bf16.mxu0 %v3993_v1 }
 0x609   : > { %3563 = vmatpush3.bf16.msra.mxu0 %v3805_v45 }
 0x60a   : > { %3564 = vmatprep.subr.bf16.mxu0 %v3993_v1 }
 0x60d   : > { %3565 = vmatpush3.bf16.msra.mxu0 %v3806_v46 }
 0x60e   : > { %3566 = vmatprep.subr.bf16.mxu0 %v3993_v1 }
 0x611   : > { %3567 = vmatpush3.bf16.msra.mxu0 %v3807_v47 }
 0x612   : > { %3568 = vmatprep.subr.bf16.mxu0 %v3993_v1 }
 0x615   : > { %3569 = vmatpush3.bf16.msra.mxu0 %v3808_v48 }
 0x616   : > { %3614 = vmatprep.subr.bf16.mxu0 %v3993_v1 }
 0x618   : > { %3571 = vmatmul.mubr.bf16.vlgmr.msra.gmra.mrb[28].mxu0 %v4206_v18 }
 0x619   : > { %3630 = vmatprep.mubr.msk.bf16.mxu0 %vm3994_vm0, %v3993_v1  ;;  %3615 = vmatpush3.bf16.msra.mxu0 %v3809_v15 }
 0x61a   : > { %3616 = vmatprep.subr.bf16.mxu0 %v3993_v1 }
 0x61d   : > { %3617 = vmatpush3.bf16.msra.mxu0 %v3811_v17 }
 0x61e   : > { %3618 = vmatprep.subr.bf16.mxu0 %v3993_v1 }
 0x621   : > { %3619 = vmatpush3.bf16.msra.mxu0 %v3813_v20 }
 0x622   : > { %3620 = vmatprep.subr.bf16.mxu0 %v3993_v1 }
 0x625   : > { %3621 = vmatpush3.bf16.msra.mxu0 %v3815_v21 }
 0x626   : > { %3622 = vmatprep.subr.bf16.mxu0 %v3993_v1 }
 0x629   : > { %3623 = vmatpush3.bf16.msra.mxu0 %v3817_v22 }
 0x62a   : > { %3624 = vmatprep.subr.bf16.mxu0 %v3993_v1 }
 0x62d   : > { %3625 = vmatpush3.bf16.msra.mxu0 %v3819_v23  ;;  %v3835_v23 = vld [vmem:[%s4845_s5 + $0x30] sm:$0xff]  }
 0x62e   : > { %3626 = vmatprep.subr.bf16.mxu0 %v3993_v1 }
 0x631   : > { %3627 = vmatpush3.bf16.msra.mxu0 %v3821_v24  ;;  %v3836_v24 = vld [vmem:[%s4845_s5 + $0x38] sm:$0xff]  }
 0x632   : > { %3628 = vmatprep.subr.bf16.mxu0 %v3993_v1 }
 0x635   : > { %3629 = vmatpush3.bf16.msra.mxu0 %v3823_v25 }
 0x636   : > { %3654 = vmatprep.subr.bf16.mxu0 %v3993_v1 }
 0x638   : > { %3631 = vmatmul.mubr.bf16.vlgmr.msra.gmra.mrb[32].mxu0 %v4206_v18 }
 0x639   : > { %3656 = vmatprep.mubr.msk.bf16.mxu0 %vm3994_vm0, %v3993_v1 }
 0x6ab   : > { %v1373_v49 = vpop.f32.mrb[20].mxu0 }
 0x6ac   : > { %v4522_v50 = vadd.f32 %v4394_v53, %v1373_v49  ;;  %v3504_v51 = vpop.f32.mrb[21].mxu0 }
 0x6ad   : > { %v1376_v52 = vpop.f32.mrb[22].mxu0  ;;  %v3827_v51 = vld [vmem:[%s4844_s4 + $0xc0] sm:$0xff]  }
 0x6ae   : > { %v3505_v54 = vpop.f32.mrb[23].mxu0  ;;  %v3828_v52 = vld [vmem:[%s4844_s4 + $0xc8] sm:$0xff]  }
 0x6af   : > { %v3829_v54 = vld [vmem:[%s4844_s4 + $0xd0] sm:$0xff]  }
 0x6cb   : > { %v1533_v55 = vpop.f32.mrb[24].mxu0 }
 0x6cc   : > { %v1539_v56 = vmul.f32 0.17677669, %v1533_v55  ;;  %v3532_v57 = vpop.f32.mrb[25].mxu0  ;;  %v3830_v55 = vld [vmem:[%s4844_s4 + $0xd8] sm:$0xff]  }
 0x6cd   : > { %v1536_v58 = vpop.f32.mrb[26].mxu0  ;;  %v3832_v57 = vld [vmem:[%s4844_s4 + $0xe8] sm:$0xff]  }
 0x6ce   : > { %v1540_v59 = vpack.c.bf16 %v1539_v56, %v1539_v56  ;;  %v3533_v60 = vpop.f32.mrb[27].mxu0  ;;  %v3831_v56 = vld [vmem:[%s4844_s4 + $0xe0] sm:$0xff]   ;;  %v3833_v58 = vld [vmem:[%s4844_s4 + $0xf0] sm:$0xff]  }
 0x6d0   : > { %3577 = vmatmul.mubr.msk.bf16.vlgmr.msra.gmra.mrb[28].mxu1 %vm781_vm1, %v1540_v59  ;;  %v3834_v59 = vld [vmem:[%s4844_s4 + $0xf8] sm:$0xff]  }
 0x6d1   : > { %3582 = vmatprep.mubr.msk.bf16.mxu1 %vm3994_vm0, %v3993_v1 }
 0x6eb   : > { %v1746_v3 = vpop.f32.mrb[28].mxu0 }
 0x6ec   : > { %v1752_v4 = vpack.c.bf16 %v1746_v3, %v1746_v3  ;;  %v3572_v5 = vpop.f32.mrb[29].mxu0 }
 0x6ed   : > { %v1749_v6 = vpop.f32.mrb[30].mxu0 }
 0x6ee   : > { %v1815_v7 = vsel %vm844_vm4, %v1752_v4, 0  ;;  %v3573_v8 = vpop.f32.mrb[31].mxu0 }
 0x6ef   : > { %3581 = vmatpush3.bf16.msra.mxu1 %v1815_v7 }
 0x6f0   : > { %3586 = vmatprep.subr.bf16.mxu1 %v3993_v1 }
 0x70b   : > { %v2126_v44 = vpop.f32.mrb[32].mxu0 }
 0x70c   : > { %v2132_v45 = vpack.c.bf16 %v2126_v44, %v2126_v44  ;;  %v3632_v46 = vpop.f32.mrb[33].mxu0  ;;  %v3840_v44 = vld [vmem:[%s4848_s8 + $0x10] ss:$8 sps:$4 sm:$0xff]  }
 0x70d   : > { %v2129_v47 = vpop.f32.mrb[34].mxu0  ;;  %v3843_v46 = vld [vmem:[%s4848_s8 + $0x20] ss:$8 sps:$4 sm:$0xff]  }
 0x70e   : > { %v2243_v48 = vsel %vm781_vm1, %v2132_v45, 0  ;;  %v3633_v49 = vpop.f32.mrb[35].mxu0  ;;  %v3845_v45 = vld [vmem:[%s4848_s8 + $0x24] ss:$8 sps:$4 sm:$0xff]  }
 0x70f   : > { %3655 = vmatpush3.bf16.xpose.msra.mxu0 %v2243_v48 }
 0x710   : > { %3660 = vmatprep.subr.bf16.mxu0 %v3993_v1 }
 0x7a3   : > { %v1793_v61 = vpop.f32.mrb[28].mxu1 }
 0x7a4   : > { %v1799_v62 = vsel %vm4258_vm2, %v1793_v61, -1000000.0  ;;  %v3578_v53 = vpop.f32.mrb[29].mxu1 }
 0x7a5   : > { %v1796_v63 = vpop.f32.mrb[30].mxu1  ;;  %v1800_v0 = vsel %vm829_vm3, %v1799_v62, -inf }
 0x7a6   : > { %1801 = vmax.xlane.f32.xlu0 %v1800_v0  ;;  %v3579_v2 = vpop.f32.mrb[31].mxu1 }
 0x833   : > { %v1802_v9 = vpop.xlane.xlu0 %1801 }
 0x834   : > { %v1803_v10 = vsub.f32 %v1799_v62, %v1802_v9 }
 0x836   : > { %v1804_v11 = vmul.f32 1.442695, %v1803_v10 }
 0x838   : > { %3885 = vpow2.f32 %v1804_v11 }
 0x842   : > { %v3886_v12 = vpop.eup %3885 }
 0x843   : > { %v1806_v13 = vsel %vm829_vm3, %v3886_v12, 0.0  ;;  %v1810_v14 = vpack.c.bf16 %v3886_v12, %v3886_v12 }
 0x844   : > { %1807 = vadd.xlane.f32.xlu1 %v1806_v13 }
 0x845   : > { %3583 = vmatmul.mubr.msk.bf16.vlgmr.msra.gmra.mrb[32].mxu1 %vm829_vm3, %v1810_v14 }
 0x846   : > { %3590 = vmatprep.mubr.msk.bf16.mxu1 %vm3994_vm0, %v3993_v1  ;;  %3587 = vmatpush3.bf16.msra.mxu1 %v3810_v16 }
 0x847   : > { %3588 = vmatprep.subr.bf16.mxu1 %v3993_v1 }
 0x84a   : > { %3589 = vmatpush3.bf16.msra.mxu1 %v3812_v19 }
 0x84b   : > { %3594 = vmatprep.subr.bf16.mxu1 %v3993_v1 }
 0x8d1   : > { %v1808_v26 = vpop.xlane.xlu1 %1807 }
 0x8d2   : > { %3887 = vrcp.f32 %v1808_v26 }
 0x8dc   : > { %v3888_v27 = vpop.eup %3887 }
 0x918   : > { %v1851_v28 = vpop.f32.mrb[32].mxu1 }
 0x919   : > { %v1857_v29 = vmul.f32 %v3888_v27, %v1851_v28  ;;  %v3584_v30 = vpop.f32.mrb[33].mxu1 }
 0x91a   : > { %v1854_v31 = vpop.f32.mrb[34].mxu1 }
 0x91b   : > { %v1858_v33 = vpack.c.bf16 %v1857_v29, %v1857_v29  ;;  %v3585_v34 = vpop.f32.mrb[35].mxu1 }
 0x91d   : > { %3591 = vmatmul.mubr.msk.bf16.vlgmr.msra.gmra.mrb[36].mxu1 %vm781_vm1, %v1858_v33 }
 0x91e   : > { %3595 = vmatpush3.bf16.msra.mxu1 %v3814_v32  ;;  %3610 = vmatprep.mubr.msk.bf16.mxu1 %vm3994_vm0, %v3993_v1 }
 0x91f   : > { %3596 = vmatprep.subr.bf16.mxu1 %v3993_v1 }
 0x922   : > { %3597 = vmatpush3.bf16.msra.mxu1 %v3816_v35 }
 0x923   : > { %3598 = vmatprep.subr.bf16.mxu1 %v3993_v1 }
 0x926   : > { %3599 = vmatpush3.bf16.msra.mxu1 %v3818_v36 }
 0x927   : > { %3600 = vmatprep.subr.bf16.mxu1 %v3993_v1 }
 0x92a   : > { %3601 = vmatpush3.bf16.msra.mxu1 %v3820_v37  ;;  %v3897_v37 = vld [vmem:[%s4193_s15] sm:$0xff]  ;;  %s3193_s15 = sshll.u32 %s3982_s20, 7  ;;  %s3996_s20 = smov [#allocation4]  }
 0x92b   : > { %3602 = vmatprep.subr.bf16.mxu1 %v3993_v1  ;;  %s4793_s2 = scalar_lea.hbm %s4854_s14, %s3193_s15  ;;  %s3914_s16 = sshll.u32 %s3996_s20, 4  ;;  %s3915_s16 = int_to_ptr.vmem [resolvable:$false] %s3914_s16 }
 0x92c   : > { %s3916_s25 = scalar_lea.vmem %s3915_s16, 256  ;;  %p3917_p6 = scmp.lt.s32.totalorder %s4795_s30, %s3915_s16 }
 0x92d   : > { %p3918_p7 = scmp.lt.s32.totalorder %s3916_s25, %s3910_s28 }
 0x92e   : > { %3603 = vmatpush3.bf16.msra.mxu1 %v3822_v38 }
 0x92f   : > { %3604 = vmatprep.subr.bf16.mxu1 %v3993_v1  ;;  %p3919_p8 = por %p3918_p7, %p3917_p6 }
 0x931   : > { %p3920_p10 = pnand %p3919_p8, %p3913_p5 }
 0x932   : > { %3605 = vmatpush3.bf16.msra.mxu1 %v3824_v40  ;;  %v3837_v40 = vld [vmem:[%s4848_s8] ss:$8 sps:$4 sm:$0xff]  }
 0x933   : > { %3606 = vmatprep.subr.bf16.mxu1 %v3993_v1 }
 0x936   : > { %3607 = vmatpush3.bf16.msra.mxu1 %v3825_v41  ;;  %v3839_v41 = vld [vmem:[%s4848_s8 + $0x4] ss:$8 sps:$4 sm:$0xff]  }
 0x937   : > { %3608 = vmatprep.subr.bf16.mxu1 %v3993_v1 }
 0x93a   : > { %3609 = vmatpush3.bf16.msra.mxu1 %v3826_v43  ;;  %v3842_v43 = vld [vmem:[%s4848_s8 + $0x14] ss:$8 sps:$4 sm:$0xff]  }
 0x93b   : > { %3634 = vmatprep.subr.bf16.mxu1 %v3993_v1 }
 0x93d   : > { %3611 = vmatmul.mubr.bf16.vlgmr.msra.gmra.mrb[40].mxu1 %v4206_v18 }
 0x93e   : > { %3650 = vmatprep.mubr.msk.bf16.mxu1 %vm3994_vm0, %v3993_v1  ;;  %3635 = vmatpush3.bf16.msra.mxu1 %v3827_v51 }
 0x93f   : > { %3636 = vmatprep.subr.bf16.mxu1 %v3993_v1 }
 0x942   : > { %3637 = vmatpush3.bf16.msra.mxu1 %v3828_v52  ;;  %v3848_v52 = vld [vmem:[%s4848_s8 + $0x34] ss:$8 sps:$4 sm:$0xff]  }
 0x943   : > { %3638 = vmatprep.subr.bf16.mxu1 %v3993_v1 }
 0x946   : > { %3639 = vmatpush3.bf16.msra.mxu1 %v3829_v54  ;;  %v3846_v54 = vld [vmem:[%s4848_s8 + $0x30] ss:$8 sps:$4 sm:$0xff]  }
 0x947   : > { %3640 = vmatprep.subr.bf16.mxu1 %v3993_v1 }
 0x94a   : > { %3641 = vmatpush3.bf16.msra.mxu1 %v3830_v55  ;;  %v3851_v55 = vld [vmem:[%s4848_s8 + $0x44] ss:$8 sps:$4 sm:$0xff]  }
 0x94b   : > { %3642 = vmatprep.subr.bf16.mxu1 %v3993_v1 }
 0x94e   : > { %3643 = vmatpush3.bf16.msra.mxu1 %v3831_v56  ;;  %v3849_v56 = vld [vmem:[%s4848_s8 + $0x40] ss:$8 sps:$4 sm:$0xff]  }
 0x94f   : > { %3644 = vmatprep.subr.bf16.mxu1 %v3993_v1 }
 0x952   : > { %3645 = vmatpush3.bf16.msra.mxu1 %v3832_v57  ;;  %v3854_v57 = vld [vmem:[%s4848_s8 + $0x54] ss:$8 sps:$4 sm:$0xff]  }
 0x953   : > { %3646 = vmatprep.subr.bf16.mxu1 %v3993_v1 }
 0x956   : > { %3647 = vmatpush3.bf16.msra.mxu1 %v3833_v58  ;;  %v3852_v58 = vld [vmem:[%s4848_s8 + $0x50] ss:$8 sps:$4 sm:$0xff]  }
 0x957   : > { %3648 = vmatprep.subr.bf16.mxu1 %v3993_v1 }
 0x95a   : > { %3649 = vmatpush3.bf16.msra.mxu1 %v3834_v59  ;;  %v3857_v59 = vld [vmem:[%s4848_s8 + $0x64] ss:$8 sps:$4 sm:$0xff]  }
 0x95d   : > { %3651 = vmatmul.mubr.bf16.vlgmr.msra.gmra.mrb[44].mxu1 %v4206_v18 }
 0x9f0   : > { %v1913_v60 = vpop.f32.mrb[36].mxu1 }
 0x9f1   : > { %v1919_v61 = vadd.f32 %v1913_v60, %v4522_v50  ;;  %v3592_v62 = vpop.f32.mrb[37].mxu1  ;;  %v3855_v60 = vld [vmem:[%s4848_s8 + $0x60] ss:$8 sps:$4 sm:$0xff]  }
 0x9f2   : > { %v1916_v53 = vpop.f32.mrb[38].mxu1  ;;  %v3858_v62 = vld [vmem:[%s4848_s8 + $0x70] ss:$8 sps:$4 sm:$0xff]  }
 0x9f3   : > { %v3593_v63 = vpop.f32.mrb[39].mxu1  ;;  %v3995_v53 = vmov 0  }
 0x9f4   : > { %v3861_v63 = vld [vmem:[%s4850_s10 + $0x40] sm:$0xff]  }
 0x9f5   : > { %3332 = vmatprep.subr.bf16.mxu1 %v3861_v63 }
 0xa10   : > { %v2019_v0 = vpop.f32.mrb[40].mxu1 }
 0xa11   : > { %v2025_v2 = vmul.f32 0.17677669, %v2019_v0  ;;  %v3612_v3 = vpop.f32.mrb[41].mxu1  ;;  %v3862_v0 = vld [vmem:[%s4850_s10] sm:$0xff]  }
 0xa12   : > { %v2022_v4 = vpop.f32.mrb[42].mxu1  ;;  %3333 = vmatpush3.bf16.msra.mxu1 %v3862_v0  ;;  %v3864_v3 = vld [vmem:[%s4850_s10 + $0x8] sm:$0xff]  }
 0xa13   : > { %v2026_v5 = vpack.c.bf16 %v2025_v2, %v2025_v2  ;;  %v3613_v6 = vpop.f32.mrb[43].mxu1  ;;  %v3863_v2 = vld [vmem:[%s4850_s10 + $0x48] sm:$0xff]   ;;  %v3865_v4 = vld [vmem:[%s4850_s10 + $0x50] sm:$0xff]  }
 0xa14   : > { %3334 = vmatprep.subr.bf16.mxu1 %v3863_v2  ;;  %v3867_v6 = vld [vmem:[%s4850_s10 + $0x58] sm:$0xff]  }
 0xa15   : > { %3657 = vmatmul.mubr.msk.bf16.vlgmr.msra.gmra.mrb[36].mxu0 %vm781_vm1, %v2026_v5  ;;  %v3866_v5 = vld [vmem:[%s4850_s10 + $0x10] sm:$0xff]  }
 0xa16   : > { %3662 = vmatprep.mubr.msk.bf16.mxu0 %vm3994_vm0, %v3993_v1  ;;  %3335 = vmatpush3.bf16.msra.mxu1 %v3864_v3 }
 0xa17   : > { %3336 = vmatprep.subr.bf16.mxu1 %v3865_v4 }
 0xa1a   : > { %3337 = vmatpush3.bf16.msra.mxu1 %v3866_v5 }
 0xa1b   : > { %3338 = vmatprep.subr.bf16.mxu1 %v3867_v6 }
 0xa30   : > { %v2232_v11 = vpop.f32.mrb[44].mxu1 }
 0xa31   : > { %v2238_v12 = vpack.c.bf16 %v2232_v11, %v2232_v11  ;;  %v3652_v13 = vpop.f32.mrb[45].mxu1 }
 0xa32   : > { %v2235_v14 = vpop.f32.mrb[46].mxu1 }
 0xa33   : > { %v2301_v15 = vsel %vm844_vm4, %v2238_v12, 0  ;;  %v3653_v16 = vpop.f32.mrb[47].mxu1  ;;  %v3155_v14 = vld [vmem:[%s4846_s6] ss:$0 sm:$0xff] }
 0xa34   : > { %3661 = vmatpush3.bf16.msra.mxu0 %v2301_v15  ;;  %v3156_v16 = vld [vmem:[%s4847_s7] ss:$0 sm:$0xff] }
 0xa35   : > { %3666 = vmatprep.subr.bf16.mxu0 %v3993_v1 }
 0xae8   : > { %v2279_v7 = vpop.f32.mrb[36].mxu0 }
 0xae9   : > { %v2285_v18 = vsel %vm4258_vm2, %v2279_v7, -1000000.0  ;;  %v3658_v8 = vpop.f32.mrb[37].mxu0  ;;  %v3868_v7 = vld [vmem:[%s4850_s10 + $0x18] sm:$0xff]  }
 0xaea   : > { %v2282_v50 = vpop.f32.mrb[38].mxu0  ;;  %v2286_v9 = vsel %vm829_vm3, %v2285_v18, -inf  ;;  %3339 = vmatpush3.bf16.msra.mxu1 %v3868_v7  ;;  %v3870_v8 = vld [vmem:[%s4850_s10 + $0x20] sm:$0xff]  }
 0xaeb   : > { %2287 = vmax.xlane.f32.xlu0 %v2286_v9  ;;  %v3659_v10 = vpop.f32.mrb[39].mxu0  ;;  %v3871_v50 = vld [vmem:[%s4850_s10 + $0x68] sm:$0xff]  }
 0xaec   : > { %v3872_v9 = vld [vmem:[%s4850_s10 + $0x28] sm:$0xff]  }
 0xb78   : > { %v2288_v17 = vpop.xlane.xlu0 %2287 }
 0xb79   : > { %v2289_v19 = vsub.f32 %v2285_v18, %v2288_v17  ;;  %v3869_v18 = vld [vmem:[%s4850_s10 + $0x60] sm:$0xff]  }
 0xb7a   : > { %3340 = vmatprep.subr.bf16.mxu1 %v3869_v18 }
 0xb7b   : > { %v2290_v42 = vmul.f32 1.442695, %v2289_v19  ;;  %3341 = vmatpush3.bf16.msra.mxu1 %v3870_v8 }
 0xb7c   : > { %3342 = vmatprep.subr.bf16.mxu1 %v3871_v50 }
 0xb7d   : > { %3889 = vpow2.f32 %v2290_v42 }
 0xb7f   : > { %3343 = vmatpush3.bf16.msra.mxu1 %v3872_v9 }
 0xb87   : > { %v3890_v20 = vpop.eup %3889 }
 0xb88   : > { %v2292_v21 = vsel %vm829_vm3, %v3890_v20, 0.0  ;;  %v2296_v22 = vpack.c.bf16 %v3890_v20, %v3890_v20  ;;  %v3873_v20 = vld [vmem:[%s4850_s10 + $0x70] sm:$0xff]  }
 0xb89   : > { %2293 = vadd.xlane.f32.xlu1 %v2292_v21  ;;  %v3874_v21 = vld [vmem:[%s4850_s10 + $0x30] sm:$0xff]   ;;  %3344 = vmatprep.subr.bf16.mxu1 %v3873_v20 }
 0xb8a   : > { %3663 = vmatmul.mubr.msk.bf16.vlgmr.msra.gmra.mrb[40].mxu0 %vm829_vm3, %v2296_v22  ;;  %3345 = vmatpush3.bf16.msra.mxu1 %v3874_v21  ;;  %v3875_v22 = vld [vmem:[%s4850_s10 + $0x78] sm:$0xff]  }
 0xb8b   : > { %3670 = vmatprep.mubr.msk.bf16.mxu0 %vm3994_vm0, %v3993_v1  ;;  %3667 = vmatpush3.bf16.msra.mxu0 %v3835_v23  ;;  %v3876_v23 = vld [vmem:[%s4850_s10 + $0x38] sm:$0xff]  }
 0xb8c   : > { %3668 = vmatprep.subr.bf16.mxu0 %v3993_v1  ;;  %3346 = vmatprep.subr.bf16.mxu1 %v3875_v22 }
 0xb8e   : > { %3347 = vmatpush3.bf16.msra.mxu1 %v3876_v23 }
 0xb8f   : > { %3669 = vmatpush3.bf16.msra.mxu0 %v3836_v24  ;;  %v2455_v24 = vshrl.u32 %v461_v39, 7 }
 0xb90   : > { %2544 = vmatprep.subr.bf16.mxu0 %v3839_v41 }
 0xc16   : > { %v2294_v25 = vpop.xlane.xlu1 %2293 }
 0xc17   : > { %3891 = vrcp.f32 %v2294_v25  ;;  %v2456_v25 = vsub.s32 0, %v2455_v24 }
 0xc21   : > { %v3892_v26 = vpop.eup %3891 }
 0xc5d   : > { %v2337_v27 = vpop.f32.mrb[40].mxu0 }
 0xc5e   : > { %v2343_v28 = vmul.f32 %v3892_v26, %v2337_v27  ;;  %v3664_v29 = vpop.f32.mrb[41].mxu0  ;;  %v2452_v26 = vld [vmem:[%s4849_s9] sm:$0x3]  ;;  %v2460_v27 = vsub.s32 1, %v2455_v24 }
 0xc5f   : > { %v2340_v30 = vpop.f32.mrb[42].mxu0 }
 0xc60   : > { %v2344_v31 = vpack.c.bf16 %v2343_v28, %v2343_v28  ;;  %v3665_v32 = vpop.f32.mrb[43].mxu0  ;;  %v2457_v28 = vrot.slane %v2452_v26, %v2456_v25  ;;  %v2461_v29 = vrot.slane %v2452_v26, %v2460_v27 }
 0xc62   : > { %3671 = vmatmul.mubr.msk.bf16.vlgmr.msra.gmra.mrb[44].mxu0 %vm781_vm1, %v2344_v31 }
 0xc63   : > { %2545 = vmatpush1.bf16.msra.mxu0 %v3837_v40  ;;  %2576 = vmatprep.mubr.bf16.mxu0 %v3995_v53  ;;  %v3173_v40 = vld [vmem:[%s4851_s11] ss:$0 sm:$0xff] }
 0xc64   : > { %2546 = vmatprep.subr.bf16.mxu0 %v3842_v43 }
 0xc67   : > { %2547 = vmatpush1.bf16.msra.mxu0 %v3840_v44 }
 0xc68   : > { %2548 = vmatprep.subr.bf16.mxu0 %v3845_v45 }
 0xc6b   : > { %2549 = vmatpush1.bf16.msra.mxu0 %v3843_v46 }
 0xc6c   : > { %2550 = vmatprep.subr.bf16.mxu0 %v3848_v52 }
 0xc6f   : > { %2551 = vmatpush1.bf16.msra.mxu0 %v3846_v54 }
 0xc70   : > { %2552 = vmatprep.subr.bf16.mxu0 %v3851_v55 }
 0xc73   : > { %2553 = vmatpush1.bf16.msra.mxu0 %v3849_v56 }
 0xc74   : > { %2554 = vmatprep.subr.bf16.mxu0 %v3854_v57 }
 0xc77   : > { %2555 = vmatpush1.bf16.msra.mxu0 %v3852_v58  ;;  %v3190_v58 = vld [vmem:[%s4852_s12] ss:$0 sm:$0xff] }
 0xc78   : > { %2556 = vmatprep.subr.bf16.mxu0 %v3857_v59 }
 0xc7b   : > { %2557 = vmatpush1.bf16.msra.mxu0 %v3855_v60  ;;  %v3191_v60 = vld [vmem:[%s4853_s13] ss:$0 sm:$0xff] }
 0xd35   : > { %v2399_v33 = vpop.f32.mrb[44].mxu0 }
 0xd36   : > { %v2405_v34 = vadd.f32 %v2399_v33, %v1919_v61  ;;  %v3672_v1 = vpop.f32.mrb[45].mxu0  ;;  %v3860_v61 = vld [vmem:[%s4848_s8 + $0x74] ss:$8 sps:$4 sm:$0xff]  }
 0xd37   : > { %v2402_v35 = vpop.f32.mrb[46].mxu0  ;;  %2558 = vmatprep.subr.bf16.mxu0 %v3860_v61 }
 0xd38   : > { %v3673_v36 = vpop.f32.mrb[47].mxu0  ;;  %v2406_v38 = vadd.f32 %v3897_v37, %v2405_v34  ;;  %2559 = vmatpush1.bf16.msra.mxu0 %v3858_v62 }
 0xd3a   : > { %2407 = vadd.xlane.f32.xlu0 %v2406_v38 }
 0xdc7   : > { %v2408_v47 = vpop.xlane.xlu0 %2407 }
 0xdc8   : > { %v2410_v48 = vmul.f32 0.0078125, %v2408_v47 }
 0xdca   : > { %v2411_v49 = vsub.f32 %v2406_v38, %v2410_v48 }
 0xdcc   : > { %v2412_v51 = vmul.f32 %v2411_v49, %v2411_v49 }
 0xdce   : > { %2413 = vadd.xlane.f32.xlu1 %v2412_v51 }
 0xe5b   : > { %v2414_v10 = vpop.xlane.xlu1 %2413 }
 0xe5c   : > { %v2415_v11 = vmul.f32 0.0078125, %v2414_v10 }
 0xe5e   : > { %v2416_v12 = vadd.f32 1e-05, %v2415_v11 }
 0xe60   : > { %3893 = vrsqrt.f32 %v2416_v12 }
 0xe6a   : > { %v3894_v13 = vpop.eup %3893 }
 0xe6b   : > { %v2418_v15 = vmul.f32 %v3894_v13, %v2411_v49 }
 0xe6d   : > { %v2426_v17 = vmul.f32 %v3155_v14, %v2418_v15 }
 0xe6f   : > { %v2434_v19 = vadd.f32 %v3156_v16, %v2426_v17 }
 0xe71   : > { %v2435_v42 = vpack.c.bf16 %v2434_v19, %v2434_v19 }
 0xe73   : > { %2577 = vmatmul.mubr.bf16.vlgmr.msra.gmra.mrb[48].mxu0 %v2435_v42 }
 0xf46   : > { %v2578_v30 = vpop.f32.mrb[48].mxu0 }
 0xf47   : > { %v2579_v31 = vadd.f32 %v2578_v30, %v2457_v28  ;;  %v2580_v32 = vpop.f32.mrb[49].mxu0 }
 0xf48   : > { %v2581_v33 = vadd.f32 %v2580_v32, %v2461_v29  ;;  %v2582_v34 = vpop.f32.mrb[50].mxu0 }
 0xf49   : > { %v2585_v1 = vmax.f32 %v2579_v31, 0.0  ;;  %v2583_v35 = vpop.f32.mrb[51].mxu0 }
 0xf4a   : > { %v2586_v36 = vmax.f32 %v2581_v33, 0.0 }
 0xf4b   : > { %v2587_v38 = vpack.c.bf16 %v2585_v1, %v2585_v1 }
 0xf4c   : > { %v2588_v37 = vpack.c.bf16 %v2586_v36, %v2586_v36 }
 0xf4e   : > { %2756 = vmatprep.mubr.bf16.mxu1 %v2588_v37 }
 0xf4f   : > { %2757 = vmatmul.mubr.bf16.vlgmr.msra.gmra.mrb[48].mxu1 %v2587_v38 }
0x1022   : > { %v3348_v39 = vpop.f32.mrb[48].mxu1 }
0x1023   : > { %v3349_v41 = vpop.f32.mrb[49].mxu1 }
0x1024   : > { %v3350_v43 = vadd.f32 %v3349_v41, %v3348_v39  ;;  %v3351_v44 = vpop.f32.mrb[50].mxu1 }
0x1025   : > { %v3352_v45 = vpop.f32.mrb[51].mxu1 }
0x1026   : > { %v2759_v46 = vadd.f32 %v3350_v43, %v3173_v40 }
0x1028   : > { %v2764_v47 = vadd.f32 %v2759_v46, %v2434_v19 }
0x102a   : > { %2765 = vadd.xlane.f32.xlu0 %v2764_v47 }
0x10b7   : > { %v2766_v48 = vpop.xlane.xlu0 %2765 }
0x10b8   : > { %v2767_v49 = vmul.f32 0.0078125, %v2766_v48 }
0x10ba   : > { %v2768_v51 = vsub.f32 %v2764_v47, %v2767_v49 }
0x10bc   : > { %v2769_v52 = vmul.f32 %v2768_v51, %v2768_v51 }
0x10be   : > { %2770 = vadd.xlane.f32.xlu1 %v2769_v52 }
0x114b   : > { %v2771_v54 = vpop.xlane.xlu1 %2770 }
0x114c   : > { %v2772_v55 = vmul.f32 0.0078125, %v2771_v54 }
0x114e   : > { %v2773_v56 = vadd.f32 1e-05, %v2772_v55 }
0x1150   : > { %3895 = vrsqrt.f32 %v2773_v56 }
0x115a   : > { %v3896_v57 = vpop.eup %3895 }
0x115b   : > { %v2775_v59 = vmul.f32 %v3896_v57, %v2768_v51 }
0x115d   : > { %v2783_v61 = vmul.f32 %v3190_v58, %v2775_v59 }
0x115f   : > { %v2791_v62 = vadd.f32 %v3191_v60, %v2783_v61 }
0x1161   : > { %2792 = vst [vmem:[%s452_s21] sm:$0xff] %v2791_v62 }
0x1162   : > { %3923 = shalt.err (!%p3920_p10)
}
0x1163   : > { %s3924_s1 = scalar_lea.hbm %s4793_s2, 128  ;;  %s3928_s15 = scalar_lea.hbm %s4854_s14, 256 }
0x1164   : > { %p3925_p11 = scmp.ne.s32.totalorder %s4793_s2, %s3924_s1  ;;  %p3929_p1 = scmp.lt.u32.totalorder %s4793_s2, %s4854_s14 }
0x1165   : > { %p3930_p2 = scmp.lt.u32.totalorder %s3928_s15, %s3924_s1  ;;  %p3932_p4 = scmp.lt.u32.totalorder %s3924_s1, %s4793_s2 }
0x1166   : > { %p3926_p12 = pnand %p3925_p11, %p4115_p9 }
0x1167   : > { %p3931_p3 = por %p3930_p2, %p3929_p1 }
0x1168   : > { %p3927_p0 = pneg %p3926_p12 }
0x1169   : > { %p3933_p5 = por %p3932_p4, %p3931_p3 }
0x116b   : > { %p3934_p6 = pnand %p3933_p5, %p3927_p0 }
0x116d   : > { %3937 = shalt.err (!%p3934_p6)
}
0x116e   : > { %3674 = dma.vmem_to_hbm [thread:$0]  (%p4115_p9), %s4795_s30, 128, %s4793_s2, %s2794_s26  }
0x116f PF: > { %p3680_p7 = scmp.ge.s32.totalorder %s3990_s22, 2  ;;  %s2820_s28 = sand.u32 1, %s3970_s18  }
0x1170   : > { %s2821_s20 = scalar_lea.sflag [#allocation5], %s2820_s28 }
0x1171   : > { %p3677_p8 = pnand %p3680_p7, %p4122_p13 }
0x1173   : > { %3965 = dma.done.wait (!%p3677_p8), %s2821_s20, 128  }
0x1174   : > { %3967 = vsyncadd (!%p3677_p8), %s2821_s20, 4294967168  ;;  %s33_s22 = sadd.s32 1, %s3990_s22   ;;  %s4868_s27 = sld [smem:[#allocation10_spill]] }
0x1175   : > { %p30_p10 = scmp.ge.s32.totalorder %s33_s22, 4   ;;  %s4869_s20 = sld [smem:[#allocation8_spill]] }
0x1176   : > { %s4870_s21 = sld [smem:[#allocation9_spill]]  ;;  %s4871_s18 = smov %s3974_s19 }
0x1177   : > { %s4872_s19 = smov %s3978_s0  ;;  %32 = sbr.rel (!%p30_p10) target bundleno = 20 (0x14), region = 119 }
0x117a   : > { %s4873_s0 = smov %s4868_s27 }
0x117e   :  { %2826 = vsyncpa [#allocation5], 1 }
0x117f   :  { %2828 = vsyncpa [#allocation5 + $0x1], 1 }

</bundles_post_ra>
